<compile_context>
chip_gen: v6e
topology: v6e:2x2x1
jax: 0.10.0
libtpu: 0.0.40
codegen_flags: <defaults>
</compile_context>

<pallas_src>
import functools

import jax
import jax.numpy as jnp
from jax.experimental import pallas as pl
from jax.experimental.pallas import tpu as pltpu


def reward_head_kernel(hid_ref, w_ref, lab_ref, loss_ref, pend_ref, *, seq_len):
    """v_head projection + BCE accumulation + end-score extraction for one (b, s) tile.

    hid_ref:  (TILE_S, H) bf16 VMEM   hidden-state tile of sample b (pipelined)
    w_ref:    (1, H)      bf16 VMEM   v_head.weight, lane-dense, resident
    lab_ref:  (B,)        f32  SMEM   per-sample BCE target
    loss_ref: (1, 1)      f32  VMEM   per-sample BCE sum -> mean over seq; resident
    pend_ref: (1, 1)      f32  VMEM   sigmoid(reward)[-1] of sample b, written at finalize
    """
    b = pl.program_id(0)
    s = pl.program_id(1)
    n_s = pl.num_programs(1)

    @pl.when(s == 0)
    def _init():
        loss_ref[...] = jnp.zeros_like(loss_ref)

    # rewards = v_head(hidden_states): lane-dense broadcast-multiply + last-axis reduce.
    # Products formed in f32 (matches f32-accumulated bf16 matmul of the reference).
    hid = hid_ref[...].astype(jnp.float32)                     # (TILE_S, H)
    w = w_ref[...].astype(jnp.float32)                         # (1, H)
    rewards = jnp.sum(hid * w, axis=-1, keepdims=True)         # (TILE_S, 1) f32

    y = lab_ref[b]  # scalar BCE target for this sample

    # torch BCE = -(y*log(p) + (1-y)*log(1-p)) with log terms clamped at -100.
    # With log(p) = r - softplus(r) and log(1-p) = -softplus(r) this reduces to
    #   bce = y*min(softplus(r) - r, 100) + (1-y)*min(softplus(r), 100)
    sp = jnp.maximum(rewards, 0.0) + jnp.log(1.0 + jnp.exp(-jnp.abs(rewards)))
    bce = y * jnp.minimum(sp - rewards, 100.0) + (1.0 - y) * jnp.minimum(sp, 100.0)

    loss_ref[...] += jnp.sum(bce, axis=0, keepdims=True)

    @pl.when(s == n_s - 1)
    def _finalize():
        loss_ref[...] = loss_ref[...] * (1.0 / seq_len)        # per-sample mean over sequence
        r_last = rewards[-1:, :]                               # logit of the last token
        pend_ref[...] = 1.0 / (1.0 + jnp.exp(-r_last))         # pred_reward[-1]


def _vmem_budget_bytes():
    """Generation-aware VMEM budget: ~75% of physical capacity (compiler headroom)."""
    cap = 64 * 2**20  # conservative fallback = v7x physical VMEM
    try:
        info = pltpu.get_tpu_info()
        cap = int(getattr(info, "vmem_capacity_bytes", cap)) or cap
    except Exception:
        pass
    return (cap * 3) // 4


def _pick_tile_s(seq_len, hidden, itemsize, max_tile_bytes):
    """Largest seq tile that divides seq_len, is bf16 sublane-aligned (x16), and whose
    (tile_s, H) tile stays under max_tile_bytes.  Multi-MiB tiles hit the HBM roofline;
    tiny tiles pay the ~0.35 us per-grid-step overhead."""
    divisors = [d for d in range(16, seq_len + 1, 16) if seq_len % d == 0]
    if not divisors:
        return seq_len                      # short sequence: full-extent block
    fitting = [d for d in divisors if d * hidden * itemsize <= max_tile_bytes]
    return max(fitting) if fitting else min(divisors)


def reward_model_forward(input_ids, label_rewards, embed_table, v_head_w, tile_s=None):
    """Mirrors RewardModel.forward (loss + pred/act end scores)."""
    B, S = input_ids.shape
    H = embed_table.shape[1]

    # TODO(synk): the real base transformer (self.rwtranrsformer) is an external module;
    # it is stubbed with an embedding lookup + tanh.  In a real deployment the last
    # transformer layer should hand hidden_states to this kernel directly in bf16 (no
    # intermediate HBM round-trip); fusing the stub's gather would need an in-kernel
    # scalar-prefetch row gather of the embedding table.
    hidden_states = jnp.tanh(embed_table[input_ids]).astype(jnp.bfloat16)   # (B, S, H)

    w_row = v_head_w.reshape(1, H).astype(jnp.bfloat16)       # lane-dense resident weight
    labels = label_rewards.reshape(B).astype(jnp.float32)     # (B,)

    budget = _vmem_budget_bytes()
    itemsize = 2  # bf16 hidden states
    if tile_s is None:
        # Double-buffered hid tile dominates VMEM: keep one tile <= min(8 MiB, budget/4).
        max_tile_bytes = min(8 * 2**20, budget // 4)
        tile_s = _pick_tile_s(S, H, itemsize, max_tile_bytes)
    assert S % tile_s == 0, "sequence length must be divisible by the seq tile"

    tile_bytes = tile_s * H * itemsize
    # 2x double-buffered input tile + resident weight + outputs + compiler headroom,
    # capped by the generation-aware physical budget.
    vmem_limit = int(min(budget, max(32 * 2**20, 4 * tile_bytes)))

    loss_ps, pred_end = pl.pallas_call(
        functools.partial(reward_head_kernel, seq_len=S),
        out_shape=(
            jax.ShapeDtypeStruct((B, 1, 1), jnp.float32),   # per-sample BCE (mean over seq)
            jax.ShapeDtypeStruct((B, 1, 1), jnp.float32),   # sigmoid(reward)[-1] per sample
        ),
        grid=(B, S // tile_s),
        in_specs=[
            # TODO(synk): on v7x with necessarily-small tiles, pipeline_mode=pl.Buffered(3)
            # on this spec hides more of the DMA issue latency.
            pl.BlockSpec((None, tile_s, H), lambda b, s: (b, s, 0)),   # pipelined hid tile
            pl.BlockSpec((1, H), lambda b, s: (0, 0)),                 # resident v_head weight
            pl.BlockSpec(memory_space=pltpu.MemorySpace.SMEM),         # labels, scalar reads
        ],
        out_specs=(
            pl.BlockSpec((None, 1, 1), lambda b, s: (b, 0, 0)),
            pl.BlockSpec((None, 1, 1), lambda b, s: (b, 0, 0)),
        ),
        compiler_params=pltpu.CompilerParams(
            # Batch axis independent ("parallel"; on v7x megacore pltpu.CORE_PARALLEL is a
            # candidate), seq axis is the reduction -> "arbitrary", kept last.
            dimension_semantics=("parallel", "arbitrary"),
            vmem_limit_bytes=vmem_limit,
        ),
    )(hidden_states, w_row, labels)

    loss = jnp.mean(loss_ps[:, 0, 0])                 # mean over batch (torch: loss / bs)
    return {
        "loss": loss,
        "pred_end_scores": pred_end[:, 0, 0],         # (B,)   stack of pred_reward[-1]
        "act_end_scores": labels.reshape(B, 1),       # (B, 1) stack of [expected_reward]
    }


def _reference(input_ids, label_rewards, embed_table, v_head_w):
    """Pure-JAX reference (same bf16 hidden-state data path) for correctness check."""
    hidden = jnp.tanh(embed_table[input_ids]).astype(jnp.bfloat16)
    w = v_head_w.astype(jnp.bfloat16)
    rewards = jnp.einsum(
        "bsh,oh->bs", hidden, w,
        preferred_element_type=jnp.float32,
        precision=jax.lax.Precision.HIGHEST,
    )
    pred = 1.0 / (1.0 + jnp.exp(-rewards))
    y = label_rewards.reshape(-1, 1).astype(jnp.float32)
    logp = jnp.maximum(jnp.log(pred), -100.0)
    log1mp = jnp.maximum(jnp.log(1.0 - pred), -100.0)
    bce = -(y * logp + (1.0 - y) * log1mp)
    loss = jnp.mean(jnp.mean(bce, axis=-1))
    return loss, pred[:, -1]


if __name__ == "__main__":
    # Small but tiling-friendly shapes (bf16 hidden tiles need (16, 128)-aligned blocks).
    B, S, H, VOCAB = 2, 512, 128, 50

    key = jax.random.PRNGKey(0)
    k_ids, k_lab, k_emb, k_w = jax.random.split(key, 4)

    input_ids = jax.random.randint(k_ids, (B, S), 0, VOCAB, dtype=jnp.int32)
    label_rewards = jax.random.uniform(k_lab, (B,), dtype=jnp.float32)      # BCE targets in [0,1]
    embed_table = jax.random.normal(k_emb, (VOCAB, H), dtype=jnp.float32) * 0.5
    # nn.Linear(H, 1, bias=False).weight has shape (1, H)
    v_head_w = jax.random.normal(k_w, (1, H), dtype=jnp.float32) * (1.0 / (H ** 0.5))

    ref_loss, ref_pred_end = _reference(input_ids, label_rewards, embed_table, v_head_w)

    # 1) auto tile selection (single full-sequence tile for these shapes)
    out_auto = jax.block_until_ready(
        reward_model_forward(input_ids, label_rewards, embed_table, v_head_w))
    # 2) forced small tile -> exercises the multi-step init/accumulate/finalize path
    out_tiled = jax.block_until_ready(
        reward_model_forward(input_ids, label_rewards, embed_table, v_head_w, tile_s=128))

    for out in (out_auto, out_tiled):
        assert jnp.allclose(out["loss"], ref_loss, rtol=1e-4, atol=1e-4), (out["loss"], ref_loss)
        assert jnp.allclose(out["pred_end_scores"], ref_pred_end, rtol=1e-4, atol=1e-5), (
            out["pred_end_scores"], ref_pred_end)
        assert out["pred_end_scores"].shape == (B,)
        assert out["act_end_scores"].shape == (B, 1)

    print("KERNEL_OK")
</pallas_src>

<mosaic_0001>
module attributes {stable_mosaic.version = 11 : i64} {
  func.func @reward_head_kernel(%arg0: i32, %arg1: i32, %arg2: memref<1x512x128xbf16, #tpu.memory_space<vmem>>, %arg3: memref<1x128xbf16, #tpu.memory_space<vmem>>, %arg4: memref<2xf32, #tpu.memory_space<smem>>, %arg5: memref<1x1x1xf32, #tpu.memory_space<vmem>>, %arg6: memref<1x1x1xf32, #tpu.memory_space<vmem>>) attributes {dimension_semantics = [#tpu.dimension_semantics<parallel>, #tpu.dimension_semantics<arbitrary>], iteration_bounds = array<i64: 2, 1>, scalar_prefetch = 0 : i64, scratch_operands = 0 : i64, tpu.core_type = #tpu.core_type<tc>, window_params = [{transform_indices = @transform_0, window_bounds = array<i64: 1, 512, 128>}, {pipeline_mode = #tpu.pipeline_mode<synchronous>, transform_indices = @transform_1, window_bounds = array<i64: 1, 128>}, {transform_indices = @transform_2, window_bounds = array<i64: 2>}, {transform_indices = @transform_3, window_bounds = array<i64: 1, 1, 1>}, {transform_indices = @transform_4, window_bounds = array<i64: 1, 1, 1>}]} {
    %c0_i32 = arith.constant 0 : i32
    %0 = arith.cmpi eq, %arg1, %c0_i32 : i32
    %1 = arith.extui %0 : i1 to i32
    %c0_i32_0 = arith.constant 0 : i32
    %2 = arith.cmpi ne, %1, %c0_i32_0 : i32
    scf.if %2 {
      %cst_20 = arith.constant 0.000000e+00 : f32
      %46 = vector.broadcast %cst_20 : f32 to vector<1x1xf32>
      %c0_21 = arith.constant 0 : index
      %c0_22 = arith.constant 0 : index
      %c0_23 = arith.constant 0 : index
      %47 = vector.load %arg5[%c0_21, %c0_22, %c0_23] : memref<1x1x1xf32, #tpu.memory_space<vmem>>, vector<1x1x1xf32>
      %48 = vector.shape_cast %47 : vector<1x1x1xf32> to vector<1x1xf32>
      %49 = vector.shape_cast %46 : vector<1x1xf32> to vector<1x1x1xf32>
      tpu.vector_store %arg5[%c0_21, %c0_22, %c0_23], %49 {strides = array<i32>} : memref<1x1x1xf32, #tpu.memory_space<vmem>>, vector<1x1x1xf32>,
    } else {
    }
    %c0 = arith.constant 0 : index
    %c0_1 = arith.constant 0 : index
    %c0_2 = arith.constant 0 : index
    %3 = vector.load %arg2[%c0, %c0_1, %c0_2] : memref<1x512x128xbf16, #tpu.memory_space<vmem>>, vector<1x512x128xbf16>
    %4 = vector.shape_cast %3 : vector<1x512x128xbf16> to vector<512x128xbf16>
    %5 = arith.extf %4 : vector<512x128xbf16> to vector<512x128xf32>
    %c0_3 = arith.constant 0 : index
    %c0_4 = arith.constant 0 : index
    %6 = vector.load %arg3[%c0_3, %c0_4] : memref<1x128xbf16, #tpu.memory_space<vmem>>, vector<1x128xbf16>
    %7 = arith.extf %6 : vector<1x128xbf16> to vector<1x128xf32>
    %8 = vector.broadcast %7 : vector<1x128xf32> to vector<512x128xf32>
    %9 = arith.mulf %5, %8 : vector<512x128xf32>
    %cst = arith.constant dense<0.000000e+00> : vector<512xf32>
    %10 = vector.multi_reduction <add>, %9, %cst [1] : vector<512x128xf32> to vector<512xf32>
    %11 = vector.shape_cast %10 : vector<512xf32> to vector<512x1xf32>
    %12 = arith.index_cast %arg0 : i32 to index
    %13 = memref.load %arg4[%12] : memref<2xf32, #tpu.memory_space<smem>>
    %cst_5 = arith.constant 0.000000e+00 : f32
    %14 = vector.broadcast %cst_5 : f32 to vector<512x1xf32>
    %15 = arith.maximumf %11, %14 : vector<512x1xf32>
    %16 = math.absf %11 : vector<512x1xf32>
    %cst_6 = arith.constant 0.000000e+00 : f32
    %17 = vector.broadcast %cst_6 : f32 to vector<512x1xf32>
    %18 = arith.subf %17, %16 : vector<512x1xf32>
    %19 = math.exp %18 : vector<512x1xf32>
    %cst_7 = arith.constant 1.000000e+00 : f32
    %20 = vector.broadcast %cst_7 : f32 to vector<512x1xf32>
    %21 = arith.addf %20, %19 : vector<512x1xf32>
    %22 = math.log %21 : vector<512x1xf32>
    %23 = arith.addf %15, %22 : vector<512x1xf32>
    %24 = arith.subf %23, %11 : vector<512x1xf32>
    %cst_8 = arith.constant 1.000000e+02 : f32
    %25 = vector.broadcast %cst_8 : f32 to vector<512x1xf32>
    %26 = arith.minimumf %24, %25 : vector<512x1xf32>
    %27 = vector.broadcast %13 : f32 to vector<512x1xf32>
    %28 = arith.mulf %27, %26 : vector<512x1xf32>
    %cst_9 = arith.constant 1.000000e+00 : f32
    %29 = arith.subf %cst_9, %13 : f32
    %cst_10 = arith.constant 1.000000e+02 : f32
    %30 = vector.broadcast %cst_10 : f32 to vector<512x1xf32>
    %31 = arith.minimumf %23, %30 : vector<512x1xf32>
    %32 = vector.broadcast %29 : f32 to vector<512x1xf32>
    %33 = arith.mulf %32, %31 : vector<512x1xf32>
    %34 = arith.addf %28, %33 : vector<512x1xf32>
    %c0_11 = arith.constant 0 : index
    %c0_12 = arith.constant 0 : index
    %c0_13 = arith.constant 0 : index
    %35 = vector.load %arg5[%c0_11, %c0_12, %c0_13] : memref<1x1x1xf32, #tpu.memory_space<vmem>>, vector<1x1x1xf32>
    %36 = vector.shape_cast %35 : vector<1x1x1xf32> to vector<1x1xf32>
    %cst_14 = arith.constant dense<0.000000e+00> : vector<1xf32>
    %37 = vector.multi_reduction <add>, %34, %cst_14 [0] : vector<512x1xf32> to vector<1xf32>
    %38 = vector.shape_cast %37 : vector<1xf32> to vector<1x1xf32>
    %39 = arith.addf %36, %38 : vector<1x1xf32>
    %c0_15 = arith.constant 0 : index
    %c0_16 = arith.constant 0 : index
    %c0_17 = arith.constant 0 : index
    %40 = vector.load %arg5[%c0_15, %c0_16, %c0_17] : memref<1x1x1xf32, #tpu.memory_space<vmem>>, vector<1x1x1xf32>
    %41 = vector.shape_cast %40 : vector<1x1x1xf32> to vector<1x1xf32>
    %42 = vector.shape_cast %39 : vector<1x1xf32> to vector<1x1x1xf32>
    tpu.vector_store %arg5[%c0_15, %c0_16, %c0_17], %42 {strides = array<i32>} : memref<1x1x1xf32, #tpu.memory_space<vmem>>, vector<1x1x1xf32>,
    %c0_i32_18 = arith.constant 0 : i32
    %43 = arith.cmpi eq, %arg1, %c0_i32_18 : i32
    %44 = arith.extui %43 : i1 to i32
    %c0_i32_19 = arith.constant 0 : i32
    %45 = arith.cmpi ne, %44, %c0_i32_19 : i32
    scf.if %45 {
      %c0_20 = arith.constant 0 : index
      %c0_21 = arith.constant 0 : index
      %c0_22 = arith.constant 0 : index
      %46 = vector.load %arg5[%c0_20, %c0_21, %c0_22] : memref<1x1x1xf32, #tpu.memory_space<vmem>>, vector<1x1x1xf32>
      %47 = vector.shape_cast %46 : vector<1x1x1xf32> to vector<1x1xf32>
      %cst_23 = arith.constant 0.001953125 : f32
      %48 = vector.broadcast %cst_23 : f32 to vector<1x1xf32>
      %49 = arith.mulf %47, %48 : vector<1x1xf32>
      %c0_24 = arith.constant 0 : index
      %c0_25 = arith.constant 0 : index
      %c0_26 = arith.constant 0 : index
      %50 = vector.load %arg5[%c0_24, %c0_25, %c0_26] : memref<1x1x1xf32, #tpu.memory_space<vmem>>, vector<1x1x1xf32>
      %51 = vector.shape_cast %50 : vector<1x1x1xf32> to vector<1x1xf32>
      %52 = vector.shape_cast %49 : vector<1x1xf32> to vector<1x1x1xf32>
      tpu.vector_store %arg5[%c0_24, %c0_25, %c0_26], %52 {strides = array<i32>} : memref<1x1x1xf32, #tpu.memory_space<vmem>>, vector<1x1x1xf32>,
      %53 = vector.extract_strided_slice %11 {offsets = [511, 0], sizes = [1, 1], strides = [1, 1]} : vector<512x1xf32> to vector<1x1xf32>
      %cst_27 = arith.constant 0.000000e+00 : f32
      %54 = vector.broadcast %cst_27 : f32 to vector<1x1xf32>
      %55 = arith.subf %54, %53 : vector<1x1xf32>
      %56 = math.exp %55 : vector<1x1xf32>
      %cst_28 = arith.constant 1.000000e+00 : f32
      %57 = vector.broadcast %cst_28 : f32 to vector<1x1xf32>
      %58 = arith.addf %57, %56 : vector<1x1xf32>
      %cst_29 = arith.constant 1.000000e+00 : f32
      %59 = vector.broadcast %cst_29 : f32 to vector<1x1xf32>
      %60 = arith.divf %59, %58 : vector<1x1xf32>
      %c0_30 = arith.constant 0 : index
      %c0_31 = arith.constant 0 : index
      %c0_32 = arith.constant 0 : index
      %61 = vector.load %arg6[%c0_30, %c0_31, %c0_32] : memref<1x1x1xf32, #tpu.memory_space<vmem>>, vector<1x1x1xf32>
      %62 = vector.shape_cast %61 : vector<1x1x1xf32> to vector<1x1xf32>
      %63 = vector.shape_cast %60 : vector<1x1xf32> to vector<1x1x1xf32>
      tpu.vector_store %arg6[%c0_30, %c0_31, %c0_32], %63 {strides = array<i32>} : memref<1x1x1xf32, #tpu.memory_space<vmem>>, vector<1x1x1xf32>,
    } else {
    }
    return
  }
  func.func @transform_0(%arg0: i32, %arg1: i32) -> (i32, i32, i32) {
    %c0_i32 = arith.constant 0 : i32
    %c0_i32_0 = arith.constant 0 : i32
    return %arg0, %arg1, %c0_i32 : i32, i32, i32
  }
  func.func @transform_1(%arg0: i32, %arg1: i32) -> (i32, i32) {
    %c0_i32 = arith.constant 0 : i32
    %c0_i32_0 = arith.constant 0 : i32
    %c0_i32_1 = arith.constant 0 : i32
    return %c0_i32, %c0_i32_0 : i32, i32
  }
  func.func @transform_2(%arg0: i32, %arg1: i32) -> i32 {
    %c0_i32 = arith.constant 0 : i32
    %c0_i32_0 = arith.constant 0 : i32
    return %c0_i32 : i32
  }
  func.func @transform_3(%arg0: i32, %arg1: i32) -> (i32, i32, i32) {
    %c0_i32 = arith.constant 0 : i32
    %c0_i32_0 = arith.constant 0 : i32
    %c0_i32_1 = arith.constant 0 : i32
    return %arg0, %c0_i32, %c0_i32_0 : i32, i32, i32
  }
  func.func @transform_4(%arg0: i32, %arg1: i32) -> (i32, i32, i32) {
    %c0_i32 = arith.constant 0 : i32
    %c0_i32_0 = arith.constant 0 : i32
    %c0_i32_1 = arith.constant 0 : i32
    return %arg0, %c0_i32, %c0_i32_0 : i32, i32, i32
  }
}

</mosaic_0001>

<bundles_post_ra>
// kernel: tpu_custom_call.1
= control target key start
LH: loop header
LB: loop body
LE: loop exit
PB: predicated region body
PF: predicated region fallthrough
CT: control target
= control target key end

     0   :  { %10 = vsyncpa [#allocation3], 0  ;;  %s3210_s0 = inlined_call_operand.hbm [shape: bf16[2,512,128], index: 0, kind: input, shape index: {}]   ;;  %s3211_s1 = inlined_call_operand.vmem [shape: bf16[1,128], index: 1, kind: input, shape index: {}]   ;;  %s3212_s2 = inlined_call_operand.vmem [shape: f32[2], index: 2, kind: input, shape index: {}]   ;;  %s3213_s3 = inlined_call_operand.vmem [shape: f32[2,1,1], index: 3, kind: output, shape index: {0}]   ;;  %s3214_s4 = inlined_call_operand.vmem [shape: f32[2,1,1], index: 4, kind: output, shape index: {1}]  }
   0x1   :  { %12 = vsyncpa [#allocation3 + $0x1], 0 }
   0x2   :  { %13 = vsyncpa [#allocation4], 0  ;;  %s2375_s15 = smov 0   ;;  %s2377_s16 = smov 0  }
   0x3   :  { %s2379_s17 = smov 0   ;;  %s2381_s18 = smov 0  }
   0x4   :  { %s2383_s19 = smov 0   ;;  %s2385_s20 = smov 0  }
   0x5 LB: > { %s1744_s21 = sadd.s32 4294967295, %s2343_s20   ;;  %s40_s22 = sadd.s32 1, %s2331_s17  ;;  %s2343_s20 = sphi %s2385_s20, %s19_s20   ;;  %s2339_s19 = sphi %s2383_s19, %s3228_s19   ;;  %s2335_s18 = sphi %s2381_s18, %s3227_s18   ;;  %s2331_s17 = sphi %s2379_s17, %s3226_s17   ;;  %s2327_s16 = sphi %s2377_s16, %s3225_s16   ;;  %s2323_s15 = sphi %s2375_s15, %s3224_s15  }
   0x6   : > { %p47_p0 = scmp.ne.s32.totalorder %s2331_s17, %s2327_s16  ;;  %p48_p1 = scmp.eq.s32.totalorder %s2343_s20, 0 }
   0x7   : > { %p53_p2 = scmp.ne.s32.totalorder %s2327_s16, %s2323_s15  ;;  %p2409_p3 = scmp.eq.s32.totalorder %s1744_s21, 0 }
   0x8   : > { %p49_p4 = por %p48_p1, %p47_p0  ;;  %p1746_p5 = scmp.ge.s32.totalorder %s2343_s20, 1 }
   0x9   : > { %p2416_p6 = por %p2409_p3, %p53_p2  ;;  %p158_p7 = scmp.lt.s32.totalorder %s2343_s20, 3 }
   0xa   : > { %s174_s27 = sshll.u32 %s3212_s2, 4  ;;  %p1932_p10 = scmp.lt.s32.totalorder %s2343_s20, 2  ;;  %s175_s27 = int_to_ptr.vmem [resolvable:$true] %s174_s27 }
   0xb   : > { %s3218_s24 = scalar_select %p2416_p6, 1, 0 }
   0xc   : > { %p2424_p8 = pnand %p1746_p5, %p158_p7  ;;  %s185_s29 = sand.u32 1, %s2331_s17  }
   0xd   : > { %p2434_p12 = pnand %p1932_p10, %p49_p4  ;;  %s2246_s5 = scalar_lea.vmem %s175_s27, 16 }
   0xe   : > { %s3219_s28 = scalar_select %p2424_p8, 1, 0 }
   0xf   : > { %p1923_p9 = pneg %p2424_p8  ;;  %p2247_p13 = scmp.ne.s32.totalorder %s175_s27, %s2246_s5 }
  0x10   : > { %p2254_p5 = scmp.lt.s32.totalorder %s175_s27, %s175_s27  ;;  %p2255_p7 = scmp.lt.s32.totalorder %s2246_s5, %s2246_s5 }
  0x11   : > { %p1924_p11 = pnand %p1923_p9, %p2409_p3 }
  0x12   : > { %p2256_p6 = por %p2255_p7, %p2254_p5 }
  0x13   : > { %p2248_p0 = pneg %p1924_p11 }
  0x15   : > { %p2249_p1 = pnand %p2248_p0, %p2247_p13 }
  0x17   : > { %p2250_p2 = pneg %p2249_p1 }
  0x19   : > { %p2257_p8 = pnand %p2256_p6, %p2250_p2 }
  0x1b   : > { %2260 = shalt.err (!%p2257_p8)
}
  0x1c   : > { %s2345_s6 = smov [#allocation5]   ;;  %s31_s7 = sadd.s32 1, %s2339_s19 }
  0x1d   : > { %1926 = dma.vmem_to_smem (!%p1924_p11), %s175_s27, 16, %s2345_s6, [#allocation4]  }
  0x1e   : > { %s1749_s8 = sshll.u32 %s185_s29, 8  ;;  %p33_p4 = scmp.ge.s32.totalorder %s31_s7, 2 }
  0x1f   : > { %s1757_s9 = sshll.u32 %s2339_s19, 12  ;;  %s189_s10 = scalar_lea.vmem [#allocation2], %s1749_s8 }
  0x20   : > { %s198_s11 = sshll.u32 %s189_s10, 4  ;;  %s3230_s7 = smov (%p33_p4, %s31_s7), 0  ;;  %s199_s11 = int_to_ptr.vmem [resolvable:$true] %s198_s11 }
  0x21   : > { %s197_s14 = scalar_lea.hbm %s3210_s0, %s1757_s9  ;;  %s35_s15 = ssub.s32 %s2339_s19, %s3230_s7 }
  0x22   : > { %p2447_p6 = scmp.eq.s32.totalorder %s35_s15, 0  ;;  %s186_s25 = scalar_lea.sflag [#allocation3], %s185_s29 }
  0x23   : > { %p2263_p8 = pneg %p2434_p12  ;;  %s2274_s26 = scalar_lea.vmem %s199_s11, 4096 }
  0x24   : > { %p2275_p9 = scmp.ne.s32.totalorder %s199_s11, %s2274_s26  ;;  %s2346_s27 = smov [#allocation2]  }
  0x25   : > { %s2279_s5 = sshll.u32 %s2346_s27, 4  ;;  %s2280_s5 = int_to_ptr.vmem [resolvable:$false] %s2279_s5 }
  0x26   : > { %p2277_p10 = pnand %p2275_p9, %p2263_p8  ;;  %s2281_s6 = scalar_lea.vmem %s2280_s5, 8192 }
  0x27   : > { %p2282_p13 = scmp.lt.s32.totalorder %s199_s11, %s2280_s5  ;;  %p2283_p0 = scmp.lt.s32.totalorder %s2281_s6, %s2274_s26 }
  0x28   : > { %p2278_p11 = pneg %p2277_p10 }
  0x29   : > { %p2284_p1 = por %p2283_p0, %p2282_p13 }
  0x2b   : > { %p2285_p2 = pnand %p2284_p1, %p2278_p11 }
  0x2d   : > { %2288 = shalt.err (!%p2285_p2)
}
  0x2e   : > { %s2347_s8 = smov 64   ;;  %s2348_s29 = smov 4  }
  0x2f   : > { %1930 = dma.hbm_to_vmem [thread:$0]  (!%p2434_p12), %s197_s14, 4096, %s199_s11, %s186_s25, %s2347_s8, %s2347_s8, %s2348_s29  }
  0x30   : > { %s2460_s9 = scalar_select %p2447_p6, %s2331_s17, %s40_s22  }
  0x31   : > { %p3222_p5 = scmp.ne.s32.totalorder %s3219_s28, 0 }
  0x32   : > { %s212_s10 = sand.u32 (!%p3222_p5), 1, %s2327_s16   ;;  %p3223_p7 = scmp.ne.s32.totalorder (!%p3222_p5), %s3218_s24, 0 }
  0x33   : > { %210 = sbr.rel (%p3222_p5) target bundleno = 529 (0x211), region = 32  ;;  %s1753_s12 = sshll.u32 (!%p3222_p5), %s212_s10, 8 }
  0x34   : > { %s213_s13 = scalar_lea.sflag (!%p3222_p5), [#allocation3], %s212_s10  ;;  %s2465_s15 = scalar_lea.vmem (!%p3222_p5), [#allocation2], %s1753_s12 }
  0x38   : > { %2314 = dma.done.wait (%p3223_p7), %s213_s13, 4096  }
  0x39   : > { %2316 = vsyncadd (%p3223_p7), %s213_s13, 4294963200 }
  0x3a   : > { %2318 = dma.done.wait (%p2409_p3), [#allocation4], 16  }
  0x3b   : > { %2320 = vsyncadd (%p2409_p3), [#allocation4], 4294967280 }
  0x3c   : > { %225 = sfence }
  0x3d   : > { %v388_v0 = vld [vmem:[%s3211_s1] sm:$0x1]  ;;  %v390_v1 = vlaneseq  ;;  %v1886_v2 = vld [vmem:[%s2465_s15 + $0x8] sm:$0xff]   ;;  %v1887_v12 = vld [vmem:[%s2465_s15 + $0x10] sm:$0xff]   ;;  %s2611_s23 = sld [smem:[#allocation5 + %s2335_s18]]  ;;  %p248_p3 = scmp.lt.s32.totalorder %s2335_s18, 1 }
  0x3e   : > { %v1759_v3 = vld [vmem:[%s2465_s15] sm:$0xff]   ;;  %v389_v4 = vunpack.c.l.bf16 %v388_v0  ;;  %v1764_v6 = vunpack.c.l.bf16 %v1886_v2  ;;  %v1765_v10 = vunpack.c.h.bf16 %v1886_v2  ;;  %v1769_v17 = vunpack.c.h.bf16 %v1887_v12  ;;  %v1888_v19 = vld [vmem:[%s2465_s15 + $0x18] sm:$0xff]   ;;  %v1890_v29 = vld [vmem:[%s2465_s15 + $0x28] sm:$0xff]  }
  0x3f   : > { %v391_v5 = vshrl.u32 %v390_v1, 7  ;;  %v1760_v8 = vunpack.c.l.bf16 %v1759_v3  ;;  %v1761_v11 = vunpack.c.h.bf16 %v1759_v3  ;;  %v1768_v18 = vunpack.c.l.bf16 %v1887_v12  ;;  %v1889_v24 = vld [vmem:[%s2465_s15 + $0x20] sm:$0xff]   ;;  %v1891_v34 = vld [vmem:[%s2465_s15 + $0x30] sm:$0xff]   ;;  %v1892_v39 = vld [vmem:[%s2465_s15 + $0x38] sm:$0xff]   ;;  %s3232_s18 = smov (!%p248_p3, %s2335_s18), 1 }
  0x40   : > { %v1773_v22 = vunpack.c.h.bf16 %v1888_v19  ;;  %v1772_v23 = vunpack.c.l.bf16 %v1888_v19  ;;  %v1777_v27 = vunpack.c.h.bf16 %v1889_v24  ;;  %v1776_v28 = vunpack.c.l.bf16 %v1889_v24  ;;  %v1893_v44 = vld [vmem:[%s2465_s15 + $0x40] sm:$0xff]   ;;  %v1894_v49 = vld [vmem:[%s2465_s15 + $0x48] sm:$0xff]   ;;  %v1895_v54 = vld [vmem:[%s2465_s15 + $0x50] sm:$0xff]   ;;  %s3100_s14 = scalar_lea.vmem %s3213_s3, %s3232_s18  ;;  %s253_s26 = scalar_lea.vmem %s3214_s4, %s3232_s18 }
  0x41   : > { %v392_v7 = vsub.s32 0, %v391_v5  ;;  %v1781_v32 = vunpack.c.h.bf16 %v1890_v29  ;;  %v1780_v33 = vunpack.c.l.bf16 %v1890_v29  ;;  %v1785_v37 = vunpack.c.h.bf16 %v1891_v34  ;;  %v1896_v59 = vld [vmem:[%s2465_s15 + $0x58] sm:$0xff]   ;;  %v1897_v0 = vld [vmem:[%s2465_s15 + $0x60] sm:$0xff]   ;;  %v1898_v5 = vld [vmem:[%s2465_s15 + $0x68] sm:$0xff]  }
  0x42   : > { %v1784_v38 = vunpack.c.l.bf16 %v1891_v34  ;;  %v1789_v42 = vunpack.c.h.bf16 %v1892_v39  ;;  %v1788_v43 = vunpack.c.l.bf16 %v1892_v39  ;;  %v1793_v47 = vunpack.c.h.bf16 %v1893_v44 }
  0x43   : > { %v2480_v9 = vrot.slane %v389_v4, %v392_v7  ;;  %v1792_v48 = vunpack.c.l.bf16 %v1893_v44  ;;  %v1797_v52 = vunpack.c.h.bf16 %v1894_v49  ;;  %v1796_v53 = vunpack.c.l.bf16 %v1894_v49  ;;  %s1356_s24 = ssub.f32 1.0, %s2611_s23 }
  0x44   : > { %v1801_v57 = vunpack.c.h.bf16 %v1895_v54  ;;  %v1800_v58 = vunpack.c.l.bf16 %v1895_v54  ;;  %v1805_v62 = vunpack.c.h.bf16 %v1896_v59  ;;  %v1804_v63 = vunpack.c.l.bf16 %v1896_v59 }
  0x45   : > { %v396_v13 = vmul.f32 %v1764_v6, %v2480_v9  ;;  %v394_v14 = vmul.f32 %v1760_v8, %v2480_v9  ;;  %v397_v15 = vmul.f32 %v1765_v10, %v2480_v9  ;;  %v395_v16 = vmul.f32 %v1761_v11, %v2480_v9  ;;  %v1899_v11 = vld [vmem:[%s2465_s15 + $0x70] sm:$0xff]  }
  0x46   : > { %v399_v20 = vmul.f32 %v1769_v17, %v2480_v9  ;;  %v398_v21 = vmul.f32 %v1768_v18, %v2480_v9  ;;  %v401_v25 = vmul.f32 %v1773_v22, %v2480_v9  ;;  %v400_v26 = vmul.f32 %v1772_v23, %v2480_v9 }
  0x47   : > { %462 = vadd.xlane.f32.xlu1 %v396_v13  ;;  %458 = vadd.xlane.f32.xlu0 %v394_v14  ;;  %v403_v30 = vmul.f32 %v1777_v27, %v2480_v9  ;;  %v402_v31 = vmul.f32 %v1776_v28, %v2480_v9  ;;  %v405_v35 = vmul.f32 %v1781_v32, %v2480_v9  ;;  %v1809_v3 = vunpack.c.h.bf16 %v1897_v0 }
  0x48   : > { %v404_v36 = vmul.f32 %v1780_v33, %v2480_v9  ;;  %v407_v40 = vmul.f32 %v1785_v37, %v2480_v9  ;;  %v406_v41 = vmul.f32 %v1784_v38, %v2480_v9  ;;  %v409_v45 = vmul.f32 %v1789_v42, %v2480_v9 }
  0x49   : > { %v408_v46 = vmul.f32 %v1788_v43, %v2480_v9  ;;  %v411_v50 = vmul.f32 %v1793_v47, %v2480_v9  ;;  %v410_v51 = vmul.f32 %v1792_v48, %v2480_v9  ;;  %v413_v55 = vmul.f32 %v1797_v52, %v2480_v9 }
  0x4a   : > { %v412_v56 = vmul.f32 %v1796_v53, %v2480_v9  ;;  %v415_v60 = vmul.f32 %v1801_v57, %v2480_v9  ;;  %v414_v61 = vmul.f32 %v1800_v58, %v2480_v9  ;;  %v417_v1 = vmul.f32 %v1805_v62, %v2480_v9 }
  0x4b   : > { %464 = vadd.xlane.f32.xlu1 %v397_v15  ;;  %460 = vadd.xlane.f32.xlu0 %v395_v16  ;;  %v416_v2 = vmul.f32 %v1804_v63, %v2480_v9  ;;  %v1808_v4 = vunpack.c.l.bf16 %v1897_v0  ;;  %v419_v6 = vmul.f32 %v1809_v3, %v2480_v9  ;;  %v1813_v8 = vunpack.c.h.bf16 %v1898_v5  ;;  %v1900_v16 = vld [vmem:[%s2465_s15 + $0x78] sm:$0xff]  }
  0x4c   : > { %v1812_v10 = vunpack.c.l.bf16 %v1898_v5  ;;  %v1817_v14 = vunpack.c.h.bf16 %v1899_v11  ;;  %v1816_v15 = vunpack.c.l.bf16 %v1899_v11  ;;  %v1821_v19 = vunpack.c.h.bf16 %v1900_v16 }
  0x4d   : > { %v418_v7 = vmul.f32 %v1808_v4, %v2480_v9  ;;  %v421_v12 = vmul.f32 %v1813_v8, %v2480_v9  ;;  %vm258_vm0 = vcmask 0   ;;  %vm1635_vm1 = vcmask 7175  }
  0x4e   : > { %v420_v13 = vmul.f32 %v1812_v10, %v2480_v9  ;;  %v423_v17 = vmul.f32 %v1817_v14, %v2480_v9  ;;  %v422_v18 = vmul.f32 %v1816_v15, %v2480_v9  ;;  %v425_v22 = vmul.f32 %v1821_v19, %v2480_v9 }
  0x4f   : > { %468 = vadd.xlane.f32.xlu1 %v399_v20  ;;  %466 = vadd.xlane.f32.xlu0 %v398_v21  ;;  %v1820_v20 = vunpack.c.l.bf16 %v1900_v16  ;;  %v1901_v21 = vld [vmem:[%s2465_s15 + $0x80] sm:$0xff]  }
  0x50   : > { %v1825_v24 = vunpack.c.h.bf16 %v1901_v21 }
  0x51   : > { %v424_v23 = vmul.f32 %v1820_v20, %v2480_v9 }
  0x52   : > { %v427_v27 = vmul.f32 %v1825_v24, %v2480_v9 }
  0x53   : > { %472 = vadd.xlane.f32.xlu1 %v401_v25  ;;  %470 = vadd.xlane.f32.xlu0 %v400_v26  ;;  %v1824_v25 = vunpack.c.l.bf16 %v1901_v21  ;;  %v1902_v26 = vld [vmem:[%s2465_s15 + $0x88] sm:$0xff]  }
  0x54   : > { %v1829_v29 = vunpack.c.h.bf16 %v1902_v26 }
  0x55   : > { %v426_v28 = vmul.f32 %v1824_v25, %v2480_v9 }
  0x56   : > { %v429_v32 = vmul.f32 %v1829_v29, %v2480_v9 }
  0x57   : > { %476 = vadd.xlane.f32.xlu1 %v403_v30  ;;  %474 = vadd.xlane.f32.xlu0 %v402_v31  ;;  %v1828_v30 = vunpack.c.l.bf16 %v1902_v26  ;;  %v1903_v31 = vld [vmem:[%s2465_s15 + $0x90] sm:$0xff]  }
  0x58   : > { %v1833_v34 = vunpack.c.h.bf16 %v1903_v31 }
  0x59   : > { %v428_v33 = vmul.f32 %v1828_v30, %v2480_v9 }
  0x5a   : > { %v431_v37 = vmul.f32 %v1833_v34, %v2480_v9 }
  0x5b   : > { %480 = vadd.xlane.f32.xlu1 %v405_v35  ;;  %478 = vadd.xlane.f32.xlu0 %v404_v36  ;;  %v1832_v35 = vunpack.c.l.bf16 %v1903_v31  ;;  %v1904_v36 = vld [vmem:[%s2465_s15 + $0x98] sm:$0xff]  }
  0x5c   : > { %v1837_v39 = vunpack.c.h.bf16 %v1904_v36 }
  0x5d   : > { %v430_v38 = vmul.f32 %v1832_v35, %v2480_v9 }
  0x5e   : > { %v433_v42 = vmul.f32 %v1837_v39, %v2480_v9 }
  0x5f   : > { %484 = vadd.xlane.f32.xlu1 %v407_v40  ;;  %482 = vadd.xlane.f32.xlu0 %v406_v41  ;;  %v1836_v40 = vunpack.c.l.bf16 %v1904_v36  ;;  %v1905_v41 = vld [vmem:[%s2465_s15 + $0xa0] sm:$0xff]  }
  0x60   : > { %v1841_v44 = vunpack.c.h.bf16 %v1905_v41 }
  0x61   : > { %v432_v43 = vmul.f32 %v1836_v40, %v2480_v9 }
  0x62   : > { %v435_v47 = vmul.f32 %v1841_v44, %v2480_v9 }
  0x63   : > { %488 = vadd.xlane.f32.xlu1 %v409_v45  ;;  %486 = vadd.xlane.f32.xlu0 %v408_v46  ;;  %v1840_v45 = vunpack.c.l.bf16 %v1905_v41  ;;  %v1906_v46 = vld [vmem:[%s2465_s15 + $0xa8] sm:$0xff]  }
  0x64   : > { %v1845_v49 = vunpack.c.h.bf16 %v1906_v46 }
  0x65   : > { %v434_v48 = vmul.f32 %v1840_v45, %v2480_v9 }
  0x66   : > { %v437_v52 = vmul.f32 %v1845_v49, %v2480_v9 }
  0x67   : > { %492 = vadd.xlane.f32.xlu1 %v411_v50  ;;  %490 = vadd.xlane.f32.xlu0 %v410_v51  ;;  %v1844_v50 = vunpack.c.l.bf16 %v1906_v46  ;;  %v1907_v51 = vld [vmem:[%s2465_s15 + $0xb0] sm:$0xff]  }
  0x68   : > { %v1849_v54 = vunpack.c.h.bf16 %v1907_v51 }
  0x69   : > { %v436_v53 = vmul.f32 %v1844_v50, %v2480_v9 }
  0x6a   : > { %v439_v57 = vmul.f32 %v1849_v54, %v2480_v9 }
  0x6b   : > { %496 = vadd.xlane.f32.xlu1 %v413_v55  ;;  %494 = vadd.xlane.f32.xlu0 %v412_v56  ;;  %v1848_v55 = vunpack.c.l.bf16 %v1907_v51  ;;  %v1908_v56 = vld [vmem:[%s2465_s15 + $0xb8] sm:$0xff]  }
  0x6c   : > { %v1853_v59 = vunpack.c.h.bf16 %v1908_v56 }
  0x6d   : > { %v438_v58 = vmul.f32 %v1848_v55, %v2480_v9 }
  0x6e   : > { %v441_v62 = vmul.f32 %v1853_v59, %v2480_v9 }
  0x6f   : > { %500 = vadd.xlane.f32.xlu1 %v415_v60  ;;  %498 = vadd.xlane.f32.xlu0 %v414_v61  ;;  %v1852_v60 = vunpack.c.l.bf16 %v1908_v56  ;;  %v1909_v61 = vld [vmem:[%s2465_s15 + $0xc0] sm:$0xff]  }
  0x70   : > { %v1857_v0 = vunpack.c.h.bf16 %v1909_v61 }
  0x71   : > { %v440_v63 = vmul.f32 %v1852_v60, %v2480_v9 }
  0x72   : > { %v443_v3 = vmul.f32 %v1857_v0, %v2480_v9 }
  0x73   : > { %504 = vadd.xlane.f32.xlu1 %v417_v1  ;;  %502 = vadd.xlane.f32.xlu0 %v416_v2  ;;  %v1856_v1 = vunpack.c.l.bf16 %v1909_v61  ;;  %v1910_v2 = vld [vmem:[%s2465_s15 + $0xc8] sm:$0xff]  }
  0x74   : > { %v1861_v5 = vunpack.c.h.bf16 %v1910_v2 }
  0x75   : > { %v442_v4 = vmul.f32 %v1856_v1, %v2480_v9 }
  0x76   : > { %v445_v8 = vmul.f32 %v1861_v5, %v2480_v9 }
  0x77   : > { %508 = vadd.xlane.f32.xlu1 %v419_v6  ;;  %506 = vadd.xlane.f32.xlu0 %v418_v7  ;;  %v1860_v6 = vunpack.c.l.bf16 %v1910_v2  ;;  %v1911_v7 = vld [vmem:[%s2465_s15 + $0xd0] sm:$0xff]  }
  0x78   : > { %v1865_v11 = vunpack.c.h.bf16 %v1911_v7 }
  0x79   : > { %v444_v10 = vmul.f32 %v1860_v6, %v2480_v9 }
  0x7a   : > { %v447_v14 = vmul.f32 %v1865_v11, %v2480_v9 }
  0x7b   : > { %512 = vadd.xlane.f32.xlu1 %v421_v12  ;;  %510 = vadd.xlane.f32.xlu0 %v420_v13  ;;  %v1864_v12 = vunpack.c.l.bf16 %v1911_v7  ;;  %v1912_v13 = vld [vmem:[%s2465_s15 + $0xd8] sm:$0xff]  }
  0x7c   : > { %v1869_v16 = vunpack.c.h.bf16 %v1912_v13 }
  0x7d   : > { %v446_v15 = vmul.f32 %v1864_v12, %v2480_v9 }
  0x7e   : > { %v449_v19 = vmul.f32 %v1869_v16, %v2480_v9 }
  0x7f   : > { %516 = vadd.xlane.f32.xlu1 %v423_v17  ;;  %514 = vadd.xlane.f32.xlu0 %v422_v18  ;;  %v1868_v17 = vunpack.c.l.bf16 %v1912_v13  ;;  %v1913_v18 = vld [vmem:[%s2465_s15 + $0xe0] sm:$0xff]  }
  0x80   : > { %v1873_v21 = vunpack.c.h.bf16 %v1913_v18 }
  0x81   : > { %v448_v20 = vmul.f32 %v1868_v17, %v2480_v9 }
  0x82   : > { %v451_v24 = vmul.f32 %v1873_v21, %v2480_v9 }
  0x83   : > { %520 = vadd.xlane.f32.xlu1 %v425_v22  ;;  %518 = vadd.xlane.f32.xlu0 %v424_v23  ;;  %v1872_v22 = vunpack.c.l.bf16 %v1913_v18  ;;  %v1914_v23 = vld [vmem:[%s2465_s15 + $0xe8] sm:$0xff]  }
  0x84   : > { %v1877_v26 = vunpack.c.h.bf16 %v1914_v23 }
  0x85   : > { %v450_v25 = vmul.f32 %v1872_v22, %v2480_v9 }
  0x86   : > { %v453_v29 = vmul.f32 %v1877_v26, %v2480_v9 }
  0x87   : > { %524 = vadd.xlane.f32.xlu1 %v427_v27  ;;  %522 = vadd.xlane.f32.xlu0 %v426_v28  ;;  %v1876_v27 = vunpack.c.l.bf16 %v1914_v23  ;;  %v1915_v28 = vld [vmem:[%s2465_s15 + $0xf0] sm:$0xff]  }
  0x88   : > { %v1881_v31 = vunpack.c.h.bf16 %v1915_v28 }
  0x89   : > { %v452_v30 = vmul.f32 %v1876_v27, %v2480_v9 }
  0x8a   : > { %v455_v34 = vmul.f32 %v1881_v31, %v2480_v9 }
  0x8b   : > { %528 = vadd.xlane.f32.xlu1 %v429_v32  ;;  %526 = vadd.xlane.f32.xlu0 %v428_v33  ;;  %v1880_v32 = vunpack.c.l.bf16 %v1915_v28  ;;  %v1916_v33 = vld [vmem:[%s2465_s15 + $0xf8] sm:$0xff]  }
  0x8c   : > { %v1885_v36 = vunpack.c.h.bf16 %v1916_v33 }
  0x8d   : > { %v454_v35 = vmul.f32 %v1880_v32, %v2480_v9 }
  0x8f   : > { %532 = vadd.xlane.f32.xlu1 %v431_v37  ;;  %530 = vadd.xlane.f32.xlu0 %v430_v38  ;;  %v1884_v37 = vunpack.c.l.bf16 %v1916_v33  ;;  %v457_v38 = vmul.f32 %v1885_v36, %v2480_v9 }
  0x91   : > { %v456_v39 = vmul.f32 %v1884_v37, %v2480_v9 }
  0x93   : > { %536 = vadd.xlane.f32.xlu1 %v433_v42  ;;  %534 = vadd.xlane.f32.xlu0 %v432_v43 }
  0x97   : > { %540 = vadd.xlane.f32.xlu1 %v435_v47  ;;  %538 = vadd.xlane.f32.xlu0 %v434_v48 }
  0x9b   : > { %544 = vadd.xlane.f32.xlu1 %v437_v52  ;;  %542 = vadd.xlane.f32.xlu0 %v436_v53 }
  0x9f   : > { %548 = vadd.xlane.f32.xlu1 %v439_v57  ;;  %546 = vadd.xlane.f32.xlu0 %v438_v58 }
  0xa3   : > { %552 = vadd.xlane.f32.xlu1 %v441_v62  ;;  %550 = vadd.xlane.f32.xlu0 %v440_v63 }
  0xa7   : > { %556 = vadd.xlane.f32.xlu1 %v443_v3  ;;  %554 = vadd.xlane.f32.xlu0 %v442_v4 }
  0xab   : > { %560 = vadd.xlane.f32.xlu1 %v445_v8  ;;  %558 = vadd.xlane.f32.xlu0 %v444_v10 }
  0xaf   : > { %564 = vadd.xlane.f32.xlu1 %v447_v14  ;;  %562 = vadd.xlane.f32.xlu0 %v446_v15 }
  0xb3   : > { %568 = vadd.xlane.f32.xlu1 %v449_v19  ;;  %566 = vadd.xlane.f32.xlu0 %v448_v20 }
  0xb7   : > { %572 = vadd.xlane.f32.xlu1 %v451_v24  ;;  %570 = vadd.xlane.f32.xlu0 %v450_v25 }
  0xbb   : > { %576 = vadd.xlane.f32.xlu1 %v453_v29  ;;  %574 = vadd.xlane.f32.xlu0 %v452_v30 }
  0xbf   : > { %580 = vadd.xlane.f32.xlu1 %v455_v34  ;;  %578 = vadd.xlane.f32.xlu0 %v454_v35 }
  0xc3   : > { %584 = vadd.xlane.f32.xlu1 %v457_v38  ;;  %582 = vadd.xlane.f32.xlu0 %v456_v39 }
  0xd0   : > { %v2576_v40 = vpop.xlane.xlu1 %462  ;;  %v2578_v41 = vpop.xlane.xlu0 %458 }
  0xd1   : > { %v653_v42 = vand.u32 2147483647, %v2576_v40  ;;  %v651_v43 = vand.u32 2147483647, %v2578_v41 }
  0xd3   : > { %v717_v44 = vsub.f32 0.0, %v653_v42  ;;  %v715_v45 = vsub.f32 0.0, %v651_v43 }
  0xd4   : > { %v2582_v46 = vpop.xlane.xlu1 %464  ;;  %v2584_v47 = vpop.xlane.xlu0 %460 }
  0xd5   : > { %v783_v48 = vmul.f32 1.442695, %v717_v44  ;;  %v779_v49 = vmul.f32 1.442695, %v715_v45  ;;  %v654_v9 = vand.u32 2147483647, %v2582_v46 }
  0xd6   : > { %v652_v50 = vand.u32 2147483647, %v2584_v47 }
  0xd7   : > { %1986 = vpow2.f32 %v783_v48  ;;  %v718_v51 = vsub.f32 0.0, %v654_v9  ;;  %v2630_v9 = vstv %s2611_s23 }
  0xd8   : > { %1988 = vpow2.f32 %v779_v49  ;;  %v716_v52 = vsub.f32 0.0, %v652_v50  ;;  %v2588_v53 = vpop.xlane.xlu1 %468  ;;  %v2590_v54 = vpop.xlane.xlu0 %466 }
  0xd9   : > { %v656_v55 = vand.u32 2147483647, %v2588_v53  ;;  %v655_v56 = vand.u32 2147483647, %v2590_v54  ;;  %v785_v57 = vmul.f32 1.442695, %v718_v51 }
  0xda   : > { %v781_v58 = vmul.f32 1.442695, %v716_v52 }
  0xdb   : > { %v720_v59 = vsub.f32 0.0, %v656_v55  ;;  %v719_v60 = vsub.f32 0.0, %v655_v56  ;;  %1990 = vpow2.f32 %v785_v57  ;;  %v2636_v56 = vstv %s1356_s24 }
  0xdc   : > { %v2594_v61 = vpop.xlane.xlu1 %472  ;;  %v2596_v62 = vpop.xlane.xlu0 %470  ;;  %1992 = vpow2.f32 %v781_v58  ;;  %v589_v57 = vmax.f32 %v2576_v40, 0.0 }
  0xdd   : > { %v789_v63 = vmul.f32 1.442695, %v720_v59  ;;  %v787_v0 = vmul.f32 1.442695, %v719_v60  ;;  %v658_v1 = vand.u32 2147483647, %v2594_v61 }
  0xde   : > { %v657_v2 = vand.u32 2147483647, %v2596_v62  ;;  %v587_v60 = vmax.f32 %v2578_v41, 0.0 }
  0xdf   : > { %1994 = vpow2.f32 %v789_v63  ;;  %v722_v3 = vsub.f32 0.0, %v658_v1 }
  0xe0   : > { %1996 = vpow2.f32 %v787_v0  ;;  %v721_v4 = vsub.f32 0.0, %v657_v2  ;;  %v2600_v5 = vpop.xlane.xlu1 %476  ;;  %v2602_v6 = vpop.xlane.xlu0 %474 }
  0xe1   : > { %v660_v7 = vand.u32 2147483647, %v2600_v5  ;;  %v659_v8 = vand.u32 2147483647, %v2602_v6  ;;  %v793_v10 = vmul.f32 1.442695, %v722_v3 }
  0xe2   : > { %v791_v11 = vmul.f32 1.442695, %v721_v4  ;;  %v590_v3 = vmax.f32 %v2582_v46, 0.0 }
  0xe3   : > { %v724_v12 = vsub.f32 0.0, %v660_v7  ;;  %v723_v13 = vsub.f32 0.0, %v659_v8  ;;  %1998 = vpow2.f32 %v793_v10 }
  0xe4   : > { %v1987_v14 = vpop.eup %1986  ;;  %v2606_v15 = vpop.xlane.xlu1 %480  ;;  %2000 = vpow2.f32 %v791_v11 }
  0xe5   : > { %v2608_v16 = vpop.xlane.xlu0 %478  ;;  %v1989_v17 = vpop.eup %1988  ;;  %v909_v18 = vadd.f32 1.0, %v1987_v14  ;;  %v797_v19 = vmul.f32 1.442695, %v724_v12  ;;  %v795_v21 = vmul.f32 1.442695, %v723_v13 }
  0xe6   : > { %v907_v20 = vadd.f32 1.0, %v1989_v17  ;;  %v662_v22 = vand.u32 2147483647, %v2606_v15  ;;  %v661_v29 = vand.u32 2147483647, %v2608_v16  ;;  %v588_v17 = vmax.f32 %v2584_v47, 0.0 }
  0xe7   : > { %2002 = vlog2.f32 %v909_v18  ;;  %v592_v18 = vmax.f32 %v2588_v53, 0.0 }
  0xe8   : > { %2004 = vlog2.f32 %v907_v20  ;;  %v2614_v23 = vpop.xlane.xlu1 %484  ;;  %v1991_v25 = vpop.eup %1990  ;;  %v726_v26 = vsub.f32 0.0, %v662_v22  ;;  %v725_v42 = vsub.f32 0.0, %v661_v29  ;;  %v591_v29 = vmax.f32 %v2590_v54, 0.0 }
  0xe9   : > { %v2616_v24 = vpop.xlane.xlu0 %482  ;;  %2006 = vpow2.f32 %v797_v19  ;;  %v1993_v27 = vpop.eup %1992  ;;  %v910_v28 = vadd.f32 1.0, %v1991_v25  ;;  %v664_v31 = vand.u32 2147483647, %v2614_v23 }
  0xea   : > { %2008 = vpow2.f32 %v795_v21  ;;  %v908_v30 = vadd.f32 1.0, %v1993_v27  ;;  %v663_v33 = vand.u32 2147483647, %v2616_v24  ;;  %v801_v38 = vmul.f32 1.442695, %v726_v26 }
  0xeb   : > { %2010 = vlog2.f32 %v910_v28  ;;  %v728_v43 = vsub.f32 0.0, %v664_v31  ;;  %v799_v59 = vmul.f32 1.442695, %v725_v42  ;;  %v593_v42 = vmax.f32 %v2596_v62, 0.0 }
  0xec   : > { %v1995_v32 = vpop.eup %1994  ;;  %v2621_v34 = vpop.xlane.xlu1 %488  ;;  %2012 = vlog2.f32 %v908_v30  ;;  %v727_v45 = vsub.f32 0.0, %v663_v33 }
  0xed   : > { %v2623_v35 = vpop.xlane.xlu0 %486  ;;  %v1997_v36 = vpop.eup %1996  ;;  %v912_v37 = vadd.f32 1.0, %v1995_v32  ;;  %v666_v44 = vand.u32 2147483647, %v2621_v34  ;;  %v805_v0 = vmul.f32 1.442695, %v728_v43 }
  0xee   : > { %v911_v39 = vadd.f32 1.0, %v1997_v36  ;;  %v665_v50 = vand.u32 2147483647, %v2623_v35  ;;  %v803_v4 = vmul.f32 1.442695, %v727_v45 }
  0xef   : > { %2014 = vlog2.f32 %v912_v37  ;;  %v730_v1 = vsub.f32 0.0, %v666_v44 }
  0xf0   : > { %2016 = vlog2.f32 %v911_v39  ;;  %v2627_v48 = vpop.xlane.xlu1 %492  ;;  %v1999_v49 = vpop.eup %1998  ;;  %v729_v11 = vsub.f32 0.0, %v665_v50  ;;  %v594_v39 = vmax.f32 %v2594_v61, 0.0 }
  0xf1   : > { %2018 = vpow2.f32 %v801_v38  ;;  %v668_v51 = vand.u32 2147483647, %v2627_v48  ;;  %v2634_v52 = vpop.xlane.xlu0 %490  ;;  %v2001_v55 = vpop.eup %2000  ;;  %v914_v58 = vadd.f32 1.0, %v1999_v49  ;;  %v809_v22 = vmul.f32 1.442695, %v730_v1 }
  0xf2   : > { %v913_v63 = vadd.f32 1.0, %v2001_v55  ;;  %v667_v7 = vand.u32 2147483647, %v2634_v52  ;;  %v807_v30 = vmul.f32 1.442695, %v729_v11 }
  0xf3   : > { %2020 = vlog2.f32 %v914_v58  ;;  %v732_v12 = vsub.f32 0.0, %v668_v51 }
  0xf4   : > { %v2003_v2 = vpop.eup %2002  ;;  %2022 = vlog2.f32 %v913_v63  ;;  %v731_v27 = vsub.f32 0.0, %v667_v7 }
  0xf5   : > { %v2005_v8 = vpop.eup %2004  ;;  %v976_v10 = vmul.f32 0.6931472, %v2003_v2  ;;  %2024 = vpow2.f32 %v799_v59  ;;  %v813_v31 = vmul.f32 1.442695, %v732_v12 }
  0xf6   : > { %v2007_v13 = vpop.eup %2006  ;;  %v972_v14 = vmul.f32 0.6931472, %v2005_v8  ;;  %2026 = vpow2.f32 %v805_v0  ;;  %v811_v50 = vmul.f32 1.442695, %v731_v27 }
  0xf7   : > { %v2009_v19 = vpop.eup %2008  ;;  %v1101_v20 = vadd.f32 %v976_v10, %v589_v57  ;;  %v916_v21 = vadd.f32 1.0, %v2007_v13  ;;  %2028 = vpow2.f32 %v803_v4 }
  0xf8   : > { %v1099_v25 = vadd.f32 %v972_v14, %v587_v60  ;;  %v915_v26 = vadd.f32 1.0, %v2009_v19  ;;  %v2011_v28 = vpop.eup %2010 }
  0xf9   : > { %2030 = vlog2.f32 %v916_v21  ;;  %v2013_v32 = vpop.eup %2012  ;;  %v1165_v33 = vsub.f32 %v1101_v20, %v2576_v40  ;;  %v978_v37 = vmul.f32 0.6931472, %v2011_v28  ;;  %v1359_v44 = vmin.f32 %v1101_v20, 100.0 }
  0xfa   : > { %v1163_v36 = vsub.f32 %v1099_v25, %v2578_v41  ;;  %2032 = vlog2.f32 %v915_v26  ;;  %v974_v38 = vmul.f32 0.6931472, %v2013_v32  ;;  %v1357_v55 = vmin.f32 %v1099_v25, 100.0 }
  0xfb   : > { %2034 = vpow2.f32 %v809_v22  ;;  %v1102_v49 = vadd.f32 %v978_v37, %v590_v3  ;;  %v1229_v41 = vmin.f32 %v1165_v33, 100.0  ;;  %v1424_v3 = vmul.f32 %v2636_v56, %v1359_v44 }
  0xfc   : > { %v2015_v43 = vpop.eup %2014  ;;  %v1227_v45 = vmin.f32 %v1163_v36, 100.0  ;;  %v1100_v57 = vadd.f32 %v974_v38, %v588_v17  ;;  %2036 = vpow2.f32 %v807_v30  ;;  %v1422_v10 = vmul.f32 %v2636_v56, %v1357_v55 }
  0xfd   : > { %v2017_v51 = vpop.eup %2016  ;;  %v982_v58 = vmul.f32 0.6931472, %v2015_v43  ;;  %v1166_v59 = vsub.f32 %v1102_v49, %v2582_v46  ;;  %2038 = vpow2.f32 %v813_v31  ;;  %v1294_v14 = vmul.f32 %v2630_v9, %v1229_v41 }
  0xfe   : > { %v2019_v40 = vpop.eup %2018  ;;  %v980_v60 = vmul.f32 0.6931472, %v2017_v51  ;;  %v1292_v63 = vmul.f32 %v2630_v9, %v1227_v45  ;;  %v1164_v0 = vsub.f32 %v1100_v57, %v2584_v47  ;;  %v1358_v1 = vmin.f32 %v1100_v57, 100.0 }
  0xff   : > { %v1104_v2 = vadd.f32 %v982_v58, %v592_v18  ;;  %v1230_v4 = vmin.f32 %v1166_v59, 100.0  ;;  %2040 = vpow2.f32 %v811_v50  ;;  %v918_v46 = vadd.f32 1.0, %v2019_v40 }
 0x100   : > { %v1103_v7 = vadd.f32 %v980_v60, %v591_v29  ;;  %v2021_v8 = vpop.eup %2020  ;;  %v1228_v11 = vmin.f32 %v1164_v0, 100.0  ;;  %v1360_v17 = vmin.f32 %v1102_v49, 100.0  ;;  %v1486_v20 = vadd.f32 %v1422_v10, %v1292_v63 }
 0x101   : > { %v1168_v12 = vsub.f32 %v1104_v2, %v2588_v53  ;;  %v2023_v13 = vpop.eup %2022  ;;  %v986_v19 = vmul.f32 0.6931472, %v2021_v8  ;;  %v1423_v22 = vmul.f32 %v2636_v56, %v1358_v1  ;;  %v1295_v27 = vmul.f32 %v2630_v9, %v1230_v4 }
 0x102   : > { %v1167_v47 = vsub.f32 %v1103_v7, %v2590_v54  ;;  %v2025_v18 = vpop.eup %2024  ;;  %v1293_v21 = vmul.f32 %v2630_v9, %v1228_v11  ;;  %v984_v25 = vmul.f32 0.6931472, %v2023_v13  ;;  %v1361_v53 = vmin.f32 %v1103_v7, 100.0  ;;  %v2662_v54 = vpop.xlane.xlu1 %496 }
 0x103   : > { %v2027_v26 = vpop.eup %2026  ;;  %v2660_v29 = vadd.f32 %v986_v19, %v594_v39  ;;  %v1232_v32 = vmin.f32 %v1168_v12, 100.0  ;;  %2042 = vlog2.f32 %v918_v46  ;;  %v595_v38 = vmax.f32 %v2602_v6, 0.0  ;;  %v2676_v12 = vpop.xlane.xlu0 %494 }
 0x104   : > { %v1231_v28 = vmin.f32 %v1167_v47, 100.0  ;;  %v2029_v30 = vpop.eup %2028  ;;  %v1487_v31 = vadd.f32 %v1423_v22, %v1293_v21  ;;  %v1105_v33 = vadd.f32 %v984_v25, %v593_v42  ;;  %v917_v43 = vadd.f32 1.0, %v2025_v18 }
 0x105   : > { %v1488_v45 = vadd.f32 %v1424_v3, %v1294_v14  ;;  %v1425_v49 = vmul.f32 %v2636_v56, %v1360_v17  ;;  %v1362_v55 = vmin.f32 %v1104_v2, 100.0  ;;  %v1426_v42 = vmul.f32 %v2636_v56, %v1361_v53 }
 0x106   : > { %v2031_v36 = vpop.eup %2030  ;;  %v1296_v37 = vmul.f32 %v2630_v9, %v1231_v28  ;;  %v1551_v50 = vadd.f32 %v1487_v31, %v1486_v20  ;;  %v1169_v39 = vsub.f32 %v1105_v33, %v2596_v62  ;;  %v1170_v57 = vsub.f32 %v2660_v29, %v2594_v61  ;;  %v2680_v19 = vpop.xlane.xlu1 %500 }
 0x107   : > { %v2033_v44 = vpop.eup %2032  ;;  %v670_v58 = vand.u32 2147483647, %v2662_v54  ;;  %v1489_v40 = vadd.f32 %v1425_v49, %v1295_v27  ;;  %v1297_v59 = vmul.f32 %v2630_v9, %v1232_v32  ;;  %v990_v1 = vmul.f32 0.6931472, %v2031_v36 }
 0x108   : > { %v2035_v51 = vpop.eup %2034  ;;  %v1552_v41 = vadd.f32 %v1551_v50, %v1488_v45  ;;  %v988_v60 = vmul.f32 0.6931472, %v2033_v44  ;;  %v1490_v0 = vadd.f32 %v1426_v42, %v1296_v37  ;;  %2044 = vlog2.f32 %v917_v43  ;;  %v2694_v43 = vpop.xlane.xlu0 %498 }
 0x109   : > { %v2037_v63 = vpop.eup %2036  ;;  %v920_v3 = vadd.f32 1.0, %v2027_v26  ;;  %v1233_v2 = vmin.f32 %v1169_v39, 100.0  ;;  %v919_v8 = vadd.f32 1.0, %v2029_v30  ;;  %v1427_v61 = vmul.f32 %v2636_v56, %v1362_v55 }
 0x10a   : > { %v2039_v62 = vpop.eup %2038  ;;  %v1553_v4 = vadd.f32 %v1552_v41, %v1489_v40  ;;  %v2673_v7 = vadd.f32 %v988_v60, %v595_v38  ;;  %v1234_v10 = vmin.f32 %v1170_v57, 100.0  ;;  %v1363_v11 = vmin.f32 %v1105_v33, 100.0  ;;  %v2698_v39 = vpop.xlane.xlu1 %504 }
 0x10b   : > { %2046 = vlog2.f32 %v920_v3  ;;  %v596_v14 = vmax.f32 %v2600_v5, 0.0  ;;  %v598_v17 = vmax.f32 %v2606_v15, 0.0  ;;  %v734_v47 = vsub.f32 0.0, %v670_v58 }
 0x10c   : > { %v2041_v46 = vpop.eup %2040  ;;  %v1554_v13 = vadd.f32 %v1553_v4, %v1490_v0  ;;  %v1491_v18 = vadd.f32 %v1427_v61, %v1297_v59  ;;  %v1364_v20 = vmin.f32 %v2660_v29, 100.0  ;;  %2048 = vlog2.f32 %v919_v8 }
 0x10d   : > { %v922_v21 = vadd.f32 1.0, %v2035_v51  ;;  %v1298_v22 = vmul.f32 %v2630_v9, %v1233_v2  ;;  %v2684_v25 = vadd.f32 %v990_v1, %v596_v14  ;;  %v1171_v26 = vsub.f32 %v2673_v7, %v2602_v6 }
 0x10e   : > { %v921_v27 = vadd.f32 1.0, %v2037_v63  ;;  %v1299_v28 = vmul.f32 %v2630_v9, %v1234_v10  ;;  %v1428_v53 = vmul.f32 %v2636_v56, %v1363_v11  ;;  %v924_v30 = vadd.f32 1.0, %v2039_v62 }
 0x10f   : > { %2050 = vlog2.f32 %v922_v21  ;;  %v1555_v31 = vadd.f32 %v1554_v13, %v1491_v18  ;;  %v923_v32 = vadd.f32 1.0, %v2041_v46  ;;  %v669_v29 = vand.u32 2147483647, %v2676_v12 }
 0x110   : > { %2052 = vlog2.f32 %v921_v27  ;;  %v2043_v33 = vpop.eup %2042  ;;  %v1429_v36 = vmul.f32 %v2636_v56, %v1364_v20  ;;  %v597_v37 = vmax.f32 %v2608_v16, 0.0  ;;  %v817_v38 = vmul.f32 1.442695, %v734_v47 }
 0x111   : > { %v672_v6 = vand.u32 2147483647, %v2680_v19  ;;  %v1492_v44 = vadd.f32 %v1428_v53, %v1298_v22  ;;  %v1172_v45 = vsub.f32 %v2684_v25, %v2600_v5  ;;  %v1235_v49 = vmin.f32 %v1171_v26, 100.0 }
 0x112   : > { %v994_v50 = vmul.f32 0.6931472, %v2043_v33  ;;  %v1493_v51 = vadd.f32 %v1429_v36, %v1299_v28  ;;  %2054 = vlog2.f32 %v924_v30  ;;  %v733_v55 = vsub.f32 0.0, %v669_v29 }
 0x113   : > { %v736_v42 = vsub.f32 0.0, %v672_v6  ;;  %v1556_v57 = vadd.f32 %v1555_v31, %v1492_v44  ;;  %v1365_v58 = vmin.f32 %v2673_v7, 100.0  ;;  %2056 = vlog2.f32 %v923_v32 }
 0x114   : > { %v671_v40 = vand.u32 2147483647, %v2694_v43  ;;  %v2702_v41 = vadd.f32 %v994_v50, %v598_v17  ;;  %v815_v59 = vmul.f32 1.442695, %v733_v55  ;;  %v674_v5 = vand.u32 2147483647, %v2698_v39  ;;  %v2711_v17 = vpop.xlane.xlu0 %502 }
 0x115   : > { %v821_v60 = vmul.f32 1.442695, %v736_v42  ;;  %v2045_v63 = vpop.eup %2044  ;;  %v1236_v0 = vmin.f32 %v1172_v45, 100.0  ;;  %v1300_v1 = vmul.f32 %v2630_v9, %v1235_v49  ;;  %2058 = vpow2.f32 %v817_v38  ;;  %v2719_v38 = vpop.xlane.xlu1 %508 }
 0x116   : > { %v735_v3 = vsub.f32 0.0, %v671_v40  ;;  %v992_v62 = vmul.f32 0.6931472, %v2045_v63  ;;  %v600_v4 = vmax.f32 %v2614_v23, 0.0  ;;  %2060 = vpow2.f32 %v815_v59 }
 0x117   : > { %v738_v2 = vsub.f32 0.0, %v674_v5  ;;  %v1366_v8 = vmin.f32 %v2684_v25, 100.0  ;;  %v1557_v61 = vadd.f32 %v1556_v57, %v1493_v51  ;;  %v1430_v10 = vmul.f32 %v2636_v56, %v1365_v58 }
 0x118   : > { %v2047_v7 = vpop.eup %2046  ;;  %v819_v11 = vmul.f32 1.442695, %v735_v3  ;;  %v1174_v46 = vsub.f32 %v2702_v41, %v2606_v15  ;;  %v1109_v13 = vadd.f32 %v992_v62, %v597_v37  ;;  %2062 = vpow2.f32 %v821_v60  ;;  %v2724_v50 = vpop.xlane.xlu0 %506 }
 0x119   : > { %v998_v14 = vmul.f32 0.6931472, %v2047_v7  ;;  %v2049_v47 = vpop.eup %2048  ;;  %v1301_v18 = vmul.f32 %v2630_v9, %v1236_v0  ;;  %v1494_v20 = vadd.f32 %v1430_v10, %v1300_v1  ;;  %v825_v21 = vmul.f32 1.442695, %v738_v2  ;;  %v2737_v10 = vpop.xlane.xlu1 %512 }
 0x11a   : > { %v1173_v22 = vsub.f32 %v1109_v13, %v2608_v16  ;;  %v996_v26 = vmul.f32 0.6931472, %v2049_v47  ;;  %2064 = vpow2.f32 %v819_v11  ;;  %v1431_v28 = vmul.f32 %v2636_v56, %v1366_v8 }
 0x11b   : > { %v1112_v25 = vadd.f32 %v998_v14, %v600_v4  ;;  %v599_v15 = vmax.f32 %v2616_v24, 0.0  ;;  %v601_v53 = vmax.f32 %v2623_v35, 0.0  ;;  %v1558_v31 = vadd.f32 %v1557_v61, %v1494_v20 }
 0x11c   : > { %v2051_v27 = vpop.eup %2050  ;;  %v1238_v32 = vmin.f32 %v1174_v46, 100.0  ;;  %v1237_v29 = vmin.f32 %v1173_v22, 100.0  ;;  %v1367_v33 = vmin.f32 %v1109_v13, 100.0  ;;  %2066 = vpow2.f32 %v825_v21  ;;  %v2741_v47 = vpop.xlane.xlu0 %510 }
 0x11d   : > { %v2053_v30 = vpop.eup %2052  ;;  %v1111_v36 = vadd.f32 %v996_v26, %v599_v15  ;;  %v673_v16 = vand.u32 2147483647, %v2711_v17  ;;  %v1495_v6 = vadd.f32 %v1431_v28, %v1301_v18  ;;  %v1368_v44 = vmin.f32 %v2702_v41, 100.0 }
 0x11e   : > { %v1000_v37 = vmul.f32 0.6931472, %v2053_v30  ;;  %v1302_v45 = vmul.f32 %v2630_v9, %v1237_v29  ;;  %v1176_v49 = vsub.f32 %v1112_v25, %v2614_v23  ;;  %v1002_v42 = vmul.f32 0.6931472, %v2051_v27 }
 0x11f   : > { %v2055_v51 = vpop.eup %2054  ;;  %v1175_v55 = vsub.f32 %v1111_v36, %v2616_v24  ;;  %v1559_v40 = vadd.f32 %v1558_v31, %v1495_v6  ;;  %v1432_v59 = vmul.f32 %v2636_v56, %v1367_v33  ;;  %v676_v60 = vand.u32 2147483647, %v2719_v38 }
 0x120   : > { %v2727_v57 = vadd.f32 %v1000_v37, %v601_v53  ;;  %v2057_v58 = vpop.eup %2056  ;;  %v1303_v41 = vmul.f32 %v2630_v9, %v1238_v32  ;;  %v602_v5 = vmax.f32 %v2621_v34, 0.0  ;;  %v604_v23 = vmax.f32 %v2627_v48, 0.0 }
 0x121   : > { %v737_v63 = vsub.f32 0.0, %v673_v16  ;;  %v1433_v1 = vmul.f32 %v2636_v56, %v1368_v44  ;;  %v1496_v24 = vadd.f32 %v1432_v59, %v1302_v45  ;;  %v1240_v3 = vmin.f32 %v1176_v49, 100.0  ;;  %v2753_v44 = vpop.xlane.xlu1 %516 }
 0x122   : > { %v2059_v0 = vpop.eup %2058  ;;  %v1239_v62 = vmin.f32 %v1175_v55, 100.0  ;;  %v1370_v2 = vmin.f32 %v1112_v25, 100.0  ;;  %v1369_v7 = vmin.f32 %v1111_v36, 100.0  ;;  %v1114_v8 = vadd.f32 %v1002_v42, %v602_v5 }
 0x123   : > { %v2061_v4 = vpop.eup %2060  ;;  %v1177_v61 = vsub.f32 %v2727_v57, %v2623_v35  ;;  %v1560_v11 = vadd.f32 %v1559_v40, %v1496_v24  ;;  %v603_v46 = vmax.f32 %v2634_v52, 0.0  ;;  %v606_v13 = vmax.f32 %v2662_v54, 0.0 }
 0x124   : > { %v740_v14 = vsub.f32 0.0, %v676_v60  ;;  %v1497_v20 = vadd.f32 %v1433_v1, %v1303_v41  ;;  %v1006_v21 = vmul.f32 0.6931472, %v2055_v51  ;;  %v1004_v22 = vmul.f32 0.6931472, %v2057_v58 }
 0x125   : > { %v2063_v18 = vpop.eup %2062  ;;  %v823_v25 = vmul.f32 1.442695, %v737_v63  ;;  %v1305_v26 = vmul.f32 %v2630_v9, %v1240_v3  ;;  %v1304_v27 = vmul.f32 %v2630_v9, %v1239_v62  ;;  %v926_v35 = vadd.f32 1.0, %v2059_v0 }
 0x126   : > { %v925_v28 = vadd.f32 1.0, %v2061_v4  ;;  %v1435_v53 = vmul.f32 %v2636_v56, %v1370_v2  ;;  %v1434_v30 = vmul.f32 %v2636_v56, %v1369_v7  ;;  %v1178_v31 = vsub.f32 %v1114_v8, %v2621_v34  ;;  %v2755_v34 = vpop.xlane.xlu0 %514  ;;  %v2769_v7 = vpop.xlane.xlu1 %520 }
 0x127   : > { %v2065_v15 = vpop.eup %2064  ;;  %v1241_v32 = vmin.f32 %v1177_v61, 100.0  ;;  %v1561_v29 = vadd.f32 %v1560_v11, %v1497_v20  ;;  %v1372_v33 = vmin.f32 %v1114_v8, 100.0  ;;  %2068 = vlog2.f32 %v926_v35 }
 0x128   : > { %v928_v36 = vadd.f32 1.0, %v2063_v18  ;;  %v1371_v37 = vmin.f32 %v2727_v57, 100.0  ;;  %v2749_v16 = vadd.f32 %v1006_v21, %v604_v23  ;;  %v2751_v6 = vadd.f32 %v1004_v22, %v603_v46 }
 0x129   : > { %2070 = vlog2.f32 %v925_v28  ;;  %v2067_v45 = vpop.eup %2066  ;;  %v1499_v49 = vadd.f32 %v1435_v53, %v1305_v26  ;;  %v1498_v51 = vadd.f32 %v1434_v30, %v1304_v27  ;;  %v927_v55 = vadd.f32 1.0, %v2065_v15 }
 0x12a   : > { %2072 = vlog2.f32 %v928_v36  ;;  %v1242_v42 = vmin.f32 %v1178_v31, 100.0  ;;  %v1306_v58 = vmul.f32 %v2630_v9, %v1241_v32  ;;  %v829_v40 = vmul.f32 1.442695, %v740_v14  ;;  %v2772_v46 = vpop.xlane.xlu0 %518 }
 0x12b   : > { %2074 = vpow2.f32 %v823_v25  ;;  %v1562_v57 = vadd.f32 %v1561_v29, %v1498_v51  ;;  %v1437_v59 = vmul.f32 %v2636_v56, %v1372_v33  ;;  %v675_v60 = vand.u32 2147483647, %v2724_v50 }
 0x12c   : > { %2076 = vlog2.f32 %v927_v55  ;;  %v1436_v41 = vmul.f32 %v2636_v56, %v1371_v37  ;;  %v1179_v5 = vsub.f32 %v2751_v6, %v2634_v52  ;;  %v930_v23 = vadd.f32 1.0, %v2067_v45 }
 0x12d   : > { %v678_v63 = vand.u32 2147483647, %v2737_v10  ;;  %v1180_v0 = vsub.f32 %v2749_v16, %v2627_v48  ;;  %2078 = vpow2.f32 %v829_v40  ;;  %v739_v1 = vsub.f32 0.0, %v675_v60 }
 0x12e   : > { %v677_v24 = vand.u32 2147483647, %v2741_v47  ;;  %v1307_v3 = vmul.f32 %v2630_v9, %v1242_v42  ;;  %v1500_v62 = vadd.f32 %v1436_v41, %v1306_v58  ;;  %v680_v2 = vand.u32 2147483647, %v2753_v44 }
 0x12f   : > { %v742_v4 = vsub.f32 0.0, %v678_v63  ;;  %v1563_v8 = vadd.f32 %v1562_v57, %v1499_v49  ;;  %v827_v52 = vmul.f32 1.442695, %v739_v1  ;;  %v679_v11 = vand.u32 2147483647, %v2755_v34 }
 0x130   : > { %v741_v61 = vsub.f32 0.0, %v677_v24  ;;  %v1243_v48 = vmin.f32 %v1179_v5, 100.0  ;;  %2080 = vlog2.f32 %v930_v23  ;;  %v744_v18 = vsub.f32 0.0, %v680_v2 }
 0x131   : > { %v833_v14 = vmul.f32 1.442695, %v742_v4  ;;  %2082 = vpow2.f32 %v827_v52  ;;  %v743_v21 = vsub.f32 0.0, %v679_v11  ;;  %v682_v22 = vand.u32 2147483647, %v2769_v7  ;;  %v2791_v52 = vpop.xlane.xlu0 %522 }
 0x132   : > { %v831_v20 = vmul.f32 1.442695, %v741_v61  ;;  %v1373_v25 = vmin.f32 %v2751_v6, 100.0  ;;  %v837_v26 = vmul.f32 1.442695, %v744_v18  ;;  %v1564_v35 = vadd.f32 %v1563_v8, %v1500_v62 }
 0x133   : > { %2084 = vpow2.f32 %v833_v14  ;;  %v681_v27 = vand.u32 2147483647, %v2772_v46  ;;  %v835_v28 = vmul.f32 1.442695, %v743_v21  ;;  %v746_v15 = vsub.f32 0.0, %v682_v22 }
 0x134   : > { %2086 = vpow2.f32 %v831_v20  ;;  %v2069_v53 = vpop.eup %2068  ;;  %v1501_v30 = vadd.f32 %v1437_v59, %v1307_v3  ;;  %v1244_v31 = vmin.f32 %v1180_v0, 100.0  ;;  %v1308_v33 = vmul.f32 %v2630_v9, %v1243_v48  ;;  %v2783_v59 = vpop.xlane.xlu1 %524 }
 0x135   : > { %2088 = vpow2.f32 %v837_v26  ;;  %v745_v32 = vsub.f32 0.0, %v681_v27  ;;  %v1010_v36 = vmul.f32 0.6931472, %v2069_v53  ;;  %v841_v37 = vmul.f32 1.442695, %v746_v15 }
 0x136   : > { %v2071_v29 = vpop.eup %2070  ;;  %2090 = vpow2.f32 %v835_v28  ;;  %v1374_v45 = vmin.f32 %v2749_v16, 100.0  ;;  %v605_v49 = vmax.f32 %v2676_v12, 0.0  ;;  %v1565_v58 = vadd.f32 %v1564_v35, %v1501_v30 }
 0x137   : > { %v2073_v6 = vpop.eup %2072  ;;  %v1008_v51 = vmul.f32 0.6931472, %v2071_v29  ;;  %v839_v55 = vmul.f32 1.442695, %v745_v32  ;;  %v1438_v40 = vmul.f32 %v2636_v56, %v1373_v25  ;;  %v1118_v57 = vadd.f32 %v1010_v36, %v606_v13 }
 0x138   : > { %v2075_v42 = vpop.eup %2074  ;;  %2092 = vpow2.f32 %v841_v37  ;;  %v1309_v41 = vmul.f32 %v2630_v9, %v1244_v31  ;;  %v1014_v3 = vmul.f32 0.6931472, %v2073_v6  ;;  %v607_v62 = vmax.f32 %v2694_v43, 0.0  ;;  %v2796_v22 = vpop.xlane.xlu1 %528 }
 0x139   : > { %v2077_v60 = vpop.eup %2076  ;;  %v1117_v5 = vadd.f32 %v1008_v51, %v605_v49  ;;  %v929_v23 = vadd.f32 1.0, %v2075_v42  ;;  %v1502_v16 = vadd.f32 %v1438_v40, %v1308_v33  ;;  %v1182_v63 = vsub.f32 %v1118_v57, %v2662_v54 }
 0x13a   : > { %v1012_v0 = vmul.f32 0.6931472, %v2077_v60  ;;  %2094 = vpow2.f32 %v839_v55  ;;  %v2079_v1 = vpop.eup %2078  ;;  %v1439_v13 = vmul.f32 %v2636_v56, %v1374_v45  ;;  %v608_v8 = vmax.f32 %v2680_v19, 0.0  ;;  %v2805_v55 = vpop.xlane.xlu0 %526 }
 0x13b   : > { %v1181_v24 = vsub.f32 %v1117_v5, %v2676_v12  ;;  %2096 = vlog2.f32 %v929_v23  ;;  %v1566_v4 = vadd.f32 %v1565_v58, %v1502_v16  ;;  %v1375_v2 = vmin.f32 %v1117_v5, 100.0 }
 0x13c   : > { %v1246_v61 = vmin.f32 %v1182_v63, 100.0  ;;  %v1119_v54 = vadd.f32 %v1012_v0, %v607_v62  ;;  %v684_v48 = vand.u32 2147483647, %v2783_v59  ;;  %v1503_v18 = vadd.f32 %v1439_v13, %v1309_v41  ;;  %v2809_v16 = vpop.xlane.xlu1 %532 }
 0x13d   : > { %v1245_v11 = vmin.f32 %v1181_v24, 100.0  ;;  %v2081_v14 = vpop.eup %2080  ;;  %v610_v12 = vmax.f32 %v2698_v39, 0.0  ;;  %v609_v20 = vmax.f32 %v2711_v17, 0.0  ;;  %v932_v21 = vadd.f32 1.0, %v2079_v1 }
 0x13e   : > { %v2083_v25 = vpop.eup %2082  ;;  %v1376_v26 = vmin.f32 %v1118_v57, 100.0  ;;  %v1120_v35 = vadd.f32 %v1014_v3, %v608_v8  ;;  %v1183_v28 = vsub.f32 %v1119_v54, %v2694_v43  ;;  %v1567_v53 = vadd.f32 %v1566_v4, %v1503_v18 }
 0x13f   : > { %v1310_v27 = vmul.f32 %v2630_v9, %v1245_v11  ;;  %v1440_v30 = vmul.f32 %v2636_v56, %v1375_v2  ;;  %2098 = vlog2.f32 %v932_v21  ;;  %v683_v31 = vand.u32 2147483647, %v2791_v52  ;;  %v2818_v21 = vpop.xlane.xlu0 %530 }
 0x140   : > { %v2085_v15 = vpop.eup %2084  ;;  %v1311_v29 = vmul.f32 %v2630_v9, %v1246_v61  ;;  %v612_v33 = vmax.f32 %v2719_v38, 0.0  ;;  %v611_v36 = vmax.f32 %v2724_v50, 0.0  ;;  %v748_v37 = vsub.f32 0.0, %v684_v48 }
 0x141   : > { %v2087_v32 = vpop.eup %2086  ;;  %v1504_v45 = vadd.f32 %v1440_v30, %v1310_v27  ;;  %v1247_v49 = vmin.f32 %v1183_v28, 100.0  ;;  %v931_v51 = vadd.f32 1.0, %v2083_v25  ;;  %v934_v43 = vadd.f32 1.0, %v2085_v15  ;;  %v2821_v15 = vpop.xlane.xlu1 %536 }
 0x142   : > { %v2089_v6 = vpop.eup %2088  ;;  %v1441_v58 = vmul.f32 %v2636_v56, %v1376_v26  ;;  %v1184_v40 = vsub.f32 %v1120_v35, %v2680_v19  ;;  %v1018_v57 = vmul.f32 0.6931472, %v2081_v14  ;;  %v933_v60 = vadd.f32 1.0, %v2087_v32 }
 0x143   : > { %v2091_v42 = vpop.eup %2090  ;;  %v1568_v41 = vadd.f32 %v1567_v53, %v1504_v45  ;;  %v1377_v5 = vmin.f32 %v1119_v54, 100.0  ;;  %2100 = vlog2.f32 %v931_v51  ;;  %v747_v23 = vsub.f32 0.0, %v683_v31 }
 0x144   : > { %v1505_v0 = vadd.f32 %v1441_v58, %v1311_v29  ;;  %v1378_v1 = vmin.f32 %v1120_v35, 100.0  ;;  %2102 = vlog2.f32 %v934_v43  ;;  %v936_v24 = vadd.f32 1.0, %v2089_v6 }
 0x145   : > { %v2093_v63 = vpop.eup %2092  ;;  %v1312_v3 = vmul.f32 %v2630_v9, %v1247_v49  ;;  %2104 = vlog2.f32 %v933_v60  ;;  %v935_v62 = vadd.f32 1.0, %v2091_v42  ;;  %v686_v13 = vand.u32 2147483647, %v2796_v22 }
 0x146   : > { %v1248_v4 = vmin.f32 %v1184_v40, 100.0  ;;  %v2813_v2 = vadd.f32 %v1018_v57, %v610_v12  ;;  %v845_v8 = vmul.f32 1.442695, %v748_v37  ;;  %v685_v61 = vand.u32 2147483647, %v2805_v55 }
 0x147   : > { %v2095_v19 = vpop.eup %2094  ;;  %v1569_v54 = vadd.f32 %v1568_v41, %v1505_v0  ;;  %v1442_v48 = vmul.f32 %v2636_v56, %v1377_v5  ;;  %v938_v14 = vadd.f32 1.0, %v2093_v63  ;;  %v688_v18 = vand.u32 2147483647, %v2809_v16 }
 0x148   : > { %v2097_v11 = vpop.eup %2096  ;;  %v1443_v25 = vmul.f32 %v2636_v56, %v1378_v1  ;;  %2106 = vlog2.f32 %v936_v24  ;;  %v750_v27 = vsub.f32 0.0, %v686_v13  ;;  %v937_v12 = vadd.f32 1.0, %v2095_v19 }
 0x149   : > { %v1016_v26 = vmul.f32 0.6931472, %v2097_v11  ;;  %v1506_v35 = vadd.f32 %v1442_v48, %v1312_v3  ;;  %2108 = vlog2.f32 %v935_v62  ;;  %v749_v28 = vsub.f32 0.0, %v685_v61 }
 0x14a   : > { %v1186_v53 = vsub.f32 %v2813_v2, %v2698_v39  ;;  %v752_v31 = vsub.f32 0.0, %v688_v18  ;;  %v687_v32 = vand.u32 2147483647, %v2818_v21  ;;  %v1313_v29 = vmul.f32 %v2630_v9, %v1248_v4 }
 0x14b   : > { %v1121_v30 = vadd.f32 %v1016_v26, %v609_v20  ;;  %v1570_v37 = vadd.f32 %v1569_v54, %v1506_v35  ;;  %2110 = vlog2.f32 %v938_v14  ;;  %v843_v6 = vmul.f32 1.442695, %v747_v23 }
 0x14c   : > { %v2099_v45 = vpop.eup %2098  ;;  %v849_v51 = vmul.f32 1.442695, %v750_v27  ;;  %v751_v43 = vsub.f32 0.0, %v687_v32  ;;  %v690_v42 = vand.u32 2147483647, %v2821_v15  ;;  %2112 = vlog2.f32 %v937_v12 }
 0x14d   : > { %v1185_v49 = vsub.f32 %v1121_v30, %v2711_v17  ;;  %v1379_v58 = vmin.f32 %v1121_v30, 100.0  ;;  %v1022_v39 = vmul.f32 0.6931472, %v2099_v45  ;;  %v847_v40 = vmul.f32 1.442695, %v749_v28 }
 0x14e   : > { %v1250_v20 = vmin.f32 %v1186_v53, 100.0  ;;  %2114 = vpow2.f32 %v845_v8  ;;  %v853_v60 = vmul.f32 1.442695, %v752_v31  ;;  %v1507_v41 = vadd.f32 %v1443_v25, %v1313_v29  ;;  %v2852_v31 = vpop.xlane.xlu0 %534 }
 0x14f   : > { %v1249_v57 = vmin.f32 %v1185_v49, 100.0  ;;  %v1380_v5 = vmin.f32 %v2813_v2, 100.0  ;;  %v2834_v23 = vadd.f32 %v1022_v39, %v612_v33  ;;  %2116 = vpow2.f32 %v843_v6 }
 0x150   : > { %v2101_v17 = vpop.eup %2100  ;;  %2118 = vpow2.f32 %v849_v51  ;;  %v851_v0 = vmul.f32 1.442695, %v751_v43  ;;  %v754_v1 = vsub.f32 0.0, %v690_v42  ;;  %v1571_v3 = vadd.f32 %v1570_v37, %v1507_v41 }
 0x151   : > { %v1314_v63 = vmul.f32 %v2630_v9, %v1249_v57  ;;  %v2103_v24 = vpop.eup %2102  ;;  %v1444_v62 = vmul.f32 %v2636_v56, %v1379_v58  ;;  %v1020_v13 = vmul.f32 0.6931472, %v2101_v17  ;;  %2120 = vpow2.f32 %v847_v40  ;;  %v2859_v40 = vpop.xlane.xlu1 %540 }
 0x152   : > { %v2105_v19 = vpop.eup %2104  ;;  %v1315_v4 = vmul.f32 %v2630_v9, %v1250_v20  ;;  %v1026_v2 = vmul.f32 0.6931472, %v2103_v24  ;;  %v613_v33 = vmax.f32 %v2741_v47, 0.0  ;;  %2122 = vpow2.f32 %v853_v60 }
 0x153   : > { %v1508_v8 = vadd.f32 %v1444_v62, %v1314_v63  ;;  %v1188_v61 = vsub.f32 %v2834_v23, %v2719_v38  ;;  %v1123_v11 = vadd.f32 %v1020_v13, %v611_v36  ;;  %v1024_v54 = vmul.f32 0.6931472, %v2105_v19  ;;  %v2871_v13 = vpop.xlane.xlu0 %538 }
 0x154   : > { %v1445_v48 = vmul.f32 %v2636_v56, %v1380_v5  ;;  %v614_v14 = vmax.f32 %v2737_v10, 0.0  ;;  %2124 = vpow2.f32 %v851_v0  ;;  %v857_v18 = vmul.f32 1.442695, %v754_v1 }
 0x155   : > { %v2107_v25 = vpop.eup %2106  ;;  %v1572_v26 = vadd.f32 %v1571_v3, %v1508_v8  ;;  %v1187_v27 = vsub.f32 %v1123_v11, %v2724_v50  ;;  %v1381_v35 = vmin.f32 %v1123_v11, 100.0  ;;  %v1125_v12 = vadd.f32 %v1024_v54, %v613_v33 }
 0x156   : > { %v2109_v28 = vpop.eup %2108  ;;  %v2847_v53 = vadd.f32 %v1026_v2, %v614_v14  ;;  %v616_v38 = vmax.f32 %v2753_v44, 0.0  ;;  %v615_v36 = vmax.f32 %v2755_v34, 0.0  ;;  %v618_v30 = vmax.f32 %v2769_v7, 0.0 }
 0x157   : > { %v1509_v32 = vadd.f32 %v1445_v48, %v1315_v4  ;;  %v1252_v29 = vmin.f32 %v1188_v61, 100.0  ;;  %v1251_v37 = vmin.f32 %v1187_v27, 100.0  ;;  %v1189_v6 = vsub.f32 %v1125_v12, %v2741_v47 }
 0x158   : > { %v2111_v45 = vpop.eup %2110  ;;  %v1382_v50 = vmin.f32 %v2834_v23, 100.0  ;;  %v1030_v49 = vmul.f32 0.6931472, %v2107_v25  ;;  %v617_v51 = vmax.f32 %v2772_v46, 0.0  ;;  %2126 = vpow2.f32 %v857_v18 }
 0x159   : > { %v1573_v43 = vadd.f32 %v1572_v26, %v1509_v32  ;;  %v1316_v42 = vmul.f32 %v2630_v9, %v1251_v37  ;;  %v1446_v58 = vmul.f32 %v2636_v56, %v1381_v35  ;;  %v1028_v39 = vmul.f32 0.6931472, %v2109_v28  ;;  %v2113_v20 = vpop.eup %2112 }
 0x15a   : > { %v1190_v57 = vsub.f32 %v2847_v53, %v2737_v10  ;;  %v1253_v47 = vmin.f32 %v1189_v6, 100.0  ;;  %v620_v60 = vmax.f32 %v2783_v59, 0.0  ;;  %v689_v41 = vand.u32 2147483647, %v2852_v31 }
 0x15b   : > { %v2115_v5 = vpop.eup %2114  ;;  %v1317_v23 = vmul.f32 %v2630_v9, %v1252_v29  ;;  %v1510_v17 = vadd.f32 %v1446_v58, %v1316_v42  ;;  %v2866_v63 = vadd.f32 %v1028_v39, %v615_v36  ;;  %v619_v0 = vmax.f32 %v2791_v52, 0.0  ;;  %v2887_v42 = vpop.xlane.xlu0 %542 }
 0x15c   : > { %v2117_v1 = vpop.eup %2116  ;;  %v1383_v24 = vmin.f32 %v1125_v12, 100.0  ;;  %v1128_v3 = vadd.f32 %v1030_v49, %v616_v38  ;;  %v622_v62 = vmax.f32 %v2796_v22, 0.0  ;;  %v692_v10 = vand.u32 2147483647, %v2859_v40  ;;  %v2879_v12 = vpop.xlane.xlu1 %544 }
 0x15d   : > { %v2119_v19 = vpop.eup %2118  ;;  %v1447_v4 = vmul.f32 %v2636_v56, %v1382_v50  ;;  %v1574_v2 = vadd.f32 %v1573_v43, %v1510_v17  ;;  %v621_v33 = vmax.f32 %v2805_v55, 0.0  ;;  %v624_v8 = vmax.f32 %v2809_v16, 0.0 }
 0x15e   : > { %v2121_v61 = vpop.eup %2120  ;;  %v1254_v11 = vmin.f32 %v1190_v57, 100.0  ;;  %v1318_v54 = vmul.f32 %v2630_v9, %v1253_v47  ;;  %v1034_v48 = vmul.f32 0.6931472, %v2111_v45  ;;  %v753_v14 = vsub.f32 0.0, %v689_v41 }
 0x15f   : > { %v2123_v18 = vpop.eup %2122  ;;  %v1511_v25 = vadd.f32 %v1447_v4, %v1317_v23  ;;  %v1191_v26 = vsub.f32 %v2866_v63, %v2755_v34  ;;  %v1032_v27 = vmul.f32 0.6931472, %v2113_v20  ;;  %v940_v35 = vadd.f32 1.0, %v2115_v5 }
 0x160   : > { %v1384_v28 = vmin.f32 %v2847_v53, 100.0  ;;  %v1448_v38 = vmul.f32 %v2636_v56, %v1383_v24  ;;  %v1192_v36 = vsub.f32 %v1128_v3, %v2753_v44  ;;  %v756_v32 = vsub.f32 0.0, %v692_v10  ;;  %v2893_v23 = vpop.xlane.xlu1 %548 }
 0x161   : > { %v2125_v29 = vpop.eup %2124  ;;  %v1575_v37 = vadd.f32 %v1574_v2, %v1511_v25  ;;  %v1386_v6 = vmin.f32 %v1128_v3, 100.0  ;;  %2128 = vlog2.f32 %v940_v35  ;;  %v939_v45 = vadd.f32 1.0, %v2117_v1 }
 0x162   : > { %v1319_v50 = vmul.f32 %v2630_v9, %v1254_v11  ;;  %v1512_v49 = vadd.f32 %v1448_v38, %v1318_v54  ;;  %v2885_v34 = vadd.f32 %v1034_v48, %v618_v30  ;;  %v942_v43 = vadd.f32 1.0, %v2119_v19  ;;  %v2904_v11 = vpop.xlane.xlu0 %546 }
 0x163   : > { %v1255_v58 = vmin.f32 %v1191_v26, 100.0  ;;  %v2889_v53 = vadd.f32 %v1032_v27, %v617_v51  ;;  %2130 = vlog2.f32 %v939_v45  ;;  %v941_v39 = vadd.f32 1.0, %v2121_v61 }
 0x164   : > { %v1449_v44 = vmul.f32 %v2636_v56, %v1384_v28  ;;  %2132 = vlog2.f32 %v942_v43  ;;  %v944_v20 = vadd.f32 1.0, %v2123_v18  ;;  %v855_v57 = vmul.f32 1.442695, %v753_v14  ;;  %v2910_v38 = vpop.xlane.xlu1 %552 }
 0x165   : > { %v2127_v47 = vpop.eup %2126  ;;  %v1576_v41 = vadd.f32 %v1575_v37, %v1512_v49  ;;  %v1385_v5 = vmin.f32 %v2866_v63, 100.0  ;;  %2134 = vlog2.f32 %v941_v39  ;;  %v943_v30 = vadd.f32 1.0, %v2125_v29 }
 0x166   : > { %v1513_v17 = vadd.f32 %v1449_v44, %v1319_v50  ;;  %v1256_v1 = vmin.f32 %v1192_v36, 100.0  ;;  %v1451_v51 = vmul.f32 %v2636_v56, %v1386_v6  ;;  %v691_v24 = vand.u32 2147483647, %v2871_v13 }
 0x167   : > { %v1320_v3 = vmul.f32 %v2630_v9, %v1255_v58  ;;  %v1194_v10 = vsub.f32 %v2885_v34, %v2769_v7  ;;  %v1193_v19 = vsub.f32 %v2889_v53, %v2772_v46  ;;  %v694_v63 = vand.u32 2147483647, %v2879_v12 }
 0x168   : > { %2136 = vlog2.f32 %v944_v20  ;;  %v946_v4 = vadd.f32 1.0, %v2127_v47  ;;  %v755_v2 = vsub.f32 0.0, %v691_v24  ;;  %v693_v61 = vand.u32 2147483647, %v2887_v42 }
 0x169   : > { %v1577_v54 = vadd.f32 %v1576_v41, %v1513_v17  ;;  %v1450_v48 = vmul.f32 %v2636_v56, %v1385_v5  ;;  %2138 = vlog2.f32 %v943_v30  ;;  %v758_v14 = vsub.f32 0.0, %v694_v63 }
 0x16a   : > { %v1321_v18 = vmul.f32 %v2630_v9, %v1256_v1  ;;  %v861_v7 = vmul.f32 1.442695, %v756_v32  ;;  %v757_v25 = vsub.f32 0.0, %v693_v61  ;;  %v696_v46 = vand.u32 2147483647, %v2893_v23 }
 0x16b   : > { %v1514_v26 = vadd.f32 %v1450_v48, %v1320_v3  ;;  %v1258_v27 = vmin.f32 %v1194_v10, 100.0  ;;  %v859_v35 = vmul.f32 1.442695, %v755_v2  ;;  %v695_v28 = vand.u32 2147483647, %v2904_v11 }
 0x16c   : > { %v1257_v36 = vmin.f32 %v1193_v19, 100.0  ;;  %2140 = vlog2.f32 %v946_v4  ;;  %v865_v29 = vmul.f32 1.442695, %v758_v14  ;;  %v760_v37 = vsub.f32 0.0, %v696_v46 }
 0x16d   : > { %v1578_v6 = vadd.f32 %v1577_v54, %v1514_v26  ;;  %v1387_v45 = vmin.f32 %v2889_v53, 100.0  ;;  %2142 = vpow2.f32 %v855_v57  ;;  %v863_v50 = vmul.f32 1.442695, %v757_v25 }
 0x16e   : > { %v2129_v32 = vpop.eup %2128  ;;  %2144 = vpow2.f32 %v861_v7  ;;  %v869_v49 = vmul.f32 1.442695, %v760_v37  ;;  %v759_v43 = vsub.f32 0.0, %v695_v28  ;;  %v698_v58 = vand.u32 2147483647, %v2910_v38 }
 0x16f   : > { %v1388_v39 = vmin.f32 %v2885_v34, 100.0  ;;  %v1038_v44 = vmul.f32 0.6931472, %v2129_v32  ;;  %v623_v20 = vmax.f32 %v2818_v21, 0.0  ;;  %2146 = vpow2.f32 %v859_v35  ;;  %v2923_v34 = vpop.xlane.xlu0 %550 }
 0x170   : > { %v2131_v47 = vpop.eup %2130  ;;  %v1515_v41 = vadd.f32 %v1451_v51, %v1321_v18  ;;  %v1323_v5 = vmul.f32 %v2630_v9, %v1258_v27  ;;  %v1322_v53 = vmul.f32 %v2630_v9, %v1257_v36  ;;  %2148 = vpow2.f32 %v865_v29  ;;  %v2944_v29 = vpop.xlane.xlu1 %556 }
 0x171   : > { %v2133_v57 = vpop.eup %2132  ;;  %v1452_v30 = vmul.f32 %v2636_v56, %v1387_v45  ;;  %v2921_v17 = vadd.f32 %v1038_v44, %v620_v60  ;;  %v1036_v1 = vmul.f32 0.6931472, %v2131_v47  ;;  %2150 = vpow2.f32 %v863_v50 }
 0x172   : > { %v2135_v24 = vpop.eup %2134  ;;  %v1579_v3 = vadd.f32 %v1578_v6, %v1515_v41  ;;  %2152 = vpow2.f32 %v869_v49  ;;  %v867_v51 = vmul.f32 1.442695, %v759_v43  ;;  %v762_v10 = vsub.f32 0.0, %v698_v58 }
 0x173   : > { %v1453_v19 = vmul.f32 %v2636_v56, %v1388_v39  ;;  %v1131_v63 = vadd.f32 %v1036_v1, %v619_v0  ;;  %v1042_v4 = vmul.f32 0.6931472, %v2133_v57  ;;  %v1040_v2 = vmul.f32 0.6931472, %v2135_v24  ;;  %v2946_v37 = vpop.xlane.xlu0 %554 }
 0x174   : > { %v1516_v61 = vadd.f32 %v1452_v30, %v1322_v53  ;;  %v1196_v60 = vsub.f32 %v2921_v17, %v2783_v59  ;;  %v626_v54 = vmax.f32 %v2821_v15, 0.0  ;;  %v625_v48 = vmax.f32 %v2852_v31, 0.0 }
 0x175   : > { %v2137_v14 = vpop.eup %2136  ;;  %v1517_v18 = vadd.f32 %v1453_v19, %v1323_v5  ;;  %v1195_v7 = vsub.f32 %v1131_v63, %v2791_v52  ;;  %v628_v25 = vmax.f32 %v2859_v40, 0.0  ;;  %v627_v46 = vmax.f32 %v2871_v13, 0.0 }
 0x176   : > { %v2139_v26 = vpop.eup %2138  ;;  %v1580_v0 = vadd.f32 %v1579_v3, %v1516_v61  ;;  %v2937_v27 = vadd.f32 %v1040_v2, %v621_v33  ;;  %2154 = vpow2.f32 %v867_v51  ;;  %v873_v59 = vmul.f32 1.442695, %v762_v10 }
 0x177   : > { %v1259_v35 = vmin.f32 %v1195_v7, 100.0  ;;  %v1389_v28 = vmin.f32 %v1131_v63, 100.0  ;;  %v2941_v36 = vadd.f32 %v1042_v4, %v622_v62  ;;  %v630_v52 = vmax.f32 %v2879_v12, 0.0  ;;  %v2971_v2 = vpop.xlane.xlu0 %558 }
 0x178   : > { %v1260_v6 = vmin.f32 %v1196_v60, 100.0  ;;  %v1046_v45 = vmul.f32 0.6931472, %v2137_v14  ;;  %v629_v50 = vmax.f32 %v2887_v42, 0.0  ;;  %v697_v33 = vand.u32 2147483647, %v2923_v34 }
 0x179   : > { %v2141_v32 = vpop.eup %2140  ;;  %v1324_v49 = vmul.f32 %v2630_v9, %v1259_v35  ;;  %v1197_v43 = vsub.f32 %v2937_v27, %v2805_v55  ;;  %v1044_v62 = vmul.f32 0.6931472, %v2139_v26  ;;  %v632_v58 = vmax.f32 %v2893_v23, 0.0 }
 0x17a   : > { %v2143_v39 = vpop.eup %2142  ;;  %v1390_v44 = vmin.f32 %v2921_v17, 100.0  ;;  %v1581_v47 = vadd.f32 %v1580_v0, %v1517_v18  ;;  %2156 = vpow2.f32 %v873_v59  ;;  %v700_v41 = vand.u32 2147483647, %v2944_v29 }
 0x17b   : > { %v2145_v5 = vpop.eup %2144  ;;  %v1454_v53 = vmul.f32 %v2636_v56, %v1389_v28  ;;  %v1198_v57 = vsub.f32 %v2941_v36, %v2796_v22  ;;  %v631_v30 = vmax.f32 %v2904_v11, 0.0  ;;  %v634_v55 = vmax.f32 %v2910_v38, 0.0 }
 0x17c   : > { %v2147_v1 = vpop.eup %2146  ;;  %v1325_v24 = vmul.f32 %v2630_v9, %v1260_v6  ;;  %v2964_v17 = vadd.f32 %v1046_v45, %v624_v8  ;;  %v761_v3 = vsub.f32 0.0, %v697_v33  ;;  %v699_v51 = vand.u32 2147483647, %v2946_v37  ;;  %v2978_v45 = vpop.xlane.xlu1 %560 }
 0x17d   : > { %v2149_v10 = vpop.eup %2148  ;;  %v1518_v19 = vadd.f32 %v1454_v53, %v1324_v49  ;;  %v1261_v63 = vmin.f32 %v1197_v43, 100.0  ;;  %v2969_v22 = vadd.f32 %v1044_v62, %v623_v20  ;;  %v945_v4 = vadd.f32 1.0, %v2143_v39 }
 0x17e   : > { %v2151_v61 = vpop.eup %2150  ;;  %v1455_v60 = vmul.f32 %v2636_v56, %v1390_v44  ;;  %v1050_v14 = vmul.f32 0.6931472, %v2141_v32  ;;  %v948_v18 = vadd.f32 1.0, %v2145_v5  ;;  %v764_v8 = vsub.f32 0.0, %v700_v41 }
 0x17f   : > { %v2153_v7 = vpop.eup %2152  ;;  %v1582_v26 = vadd.f32 %v1581_v47, %v1518_v19  ;;  %v1262_v0 = vmin.f32 %v1198_v57, 100.0  ;;  %v1392_v59 = vmin.f32 %v2941_v36, 100.0  ;;  %v1391_v35 = vmin.f32 %v2937_v27, 100.0  ;;  %v2988_v47 = vpop.xlane.xlu0 %562 }
 0x180   : > { %v1200_v20 = vsub.f32 %v2964_v17, %v2809_v16  ;;  %2158 = vlog2.f32 %v945_v4  ;;  %v947_v28 = vadd.f32 1.0, %v2147_v1  ;;  %v950_v6 = vadd.f32 1.0, %v2149_v10  ;;  %v2997_v19 = vpop.xlane.xlu1 %564 }
 0x181   : > { %v1519_v33 = vadd.f32 %v1455_v60, %v1325_v24  ;;  %v1326_v32 = vmul.f32 %v2630_v9, %v1261_v63  ;;  %v1199_v49 = vsub.f32 %v2969_v22, %v2818_v21  ;;  %2160 = vlog2.f32 %v948_v18 }
 0x182   : > { %v2985_v36 = vadd.f32 %v1050_v14, %v626_v54  ;;  %2162 = vlog2.f32 %v947_v28  ;;  %v949_v27 = vadd.f32 1.0, %v2151_v61  ;;  %v952_v43 = vadd.f32 1.0, %v2153_v7 }
 0x183   : > { %v2155_v16 = vpop.eup %2154  ;;  %v1583_v62 = vadd.f32 %v1582_v26, %v1519_v33  ;;  %v1456_v39 = vmul.f32 %v2636_v56, %v1391_v35  ;;  %2164 = vlog2.f32 %v950_v6  ;;  %v763_v44 = vsub.f32 0.0, %v699_v51 }
 0x184   : > { %v1327_v41 = vmul.f32 %v2630_v9, %v1262_v0  ;;  %v1457_v21 = vmul.f32 %v2636_v56, %v1392_v59  ;;  %v1264_v5 = vmin.f32 %v1200_v20, 100.0  ;;  %2166 = vlog2.f32 %v949_v27  ;;  %v3004_v20 = vpop.xlane.xlu0 %566  ;;  %v3008_v27 = vpop.xlane.xlu1 %568 }
 0x185   : > { %v1520_v53 = vadd.f32 %v1456_v39, %v1326_v32  ;;  %v1263_v54 = vmin.f32 %v1199_v49, 100.0  ;;  %2168 = vlog2.f32 %v952_v43  ;;  %v702_v57 = vand.u32 2147483647, %v2978_v45 }
 0x186   : > { %v1394_v1 = vmin.f32 %v2964_v17, 100.0  ;;  %v1202_v24 = vsub.f32 %v2985_v36, %v2821_v15  ;;  %v951_v10 = vadd.f32 1.0, %v2155_v16  ;;  %v701_v51 = vand.u32 2147483647, %v2971_v2 }
 0x187   : > { %v2157_v63 = vpop.eup %2156  ;;  %v1584_v4 = vadd.f32 %v1583_v62, %v1520_v53  ;;  %v1393_v61 = vmin.f32 %v2969_v22, 100.0  ;;  %v871_v60 = vmul.f32 1.442695, %v761_v3  ;;  %v766_v14 = vsub.f32 0.0, %v702_v57 }
 0x188   : > { %v1521_v18 = vadd.f32 %v1457_v21, %v1327_v41  ;;  %v1329_v7 = vmul.f32 %v2630_v9, %v1264_v5  ;;  %v877_v26 = vmul.f32 1.442695, %v764_v8  ;;  %v703_v17 = vand.u32 2147483647, %v2988_v47 }
 0x189   : > { %v1328_v0 = vmul.f32 %v2630_v9, %v1263_v54  ;;  %v875_v15 = vmul.f32 1.442695, %v763_v44  ;;  %v765_v59 = vsub.f32 0.0, %v701_v51  ;;  %v704_v35 = vand.u32 2147483647, %v2997_v19 }
 0x18a   : > { %v1459_v28 = vmul.f32 %v2636_v56, %v1394_v1  ;;  %v1266_v6 = vmin.f32 %v1202_v24, 100.0  ;;  %2170 = vlog2.f32 %v951_v10  ;;  %v954_v3 = vadd.f32 1.0, %v2157_v63 }
 0x18b   : > { %v1585_v22 = vadd.f32 %v1584_v4, %v1521_v18  ;;  %v1458_v33 = vmul.f32 %v2636_v56, %v1393_v61  ;;  %2172 = vpow2.f32 %v871_v60  ;;  %v881_v8 = vmul.f32 1.442695, %v766_v14 }
 0x18c   : > { %v1523_v32 = vadd.f32 %v1459_v28, %v1329_v7  ;;  %2174 = vpow2.f32 %v877_v26  ;;  %v767_v49 = vsub.f32 0.0, %v703_v17  ;;  %v705_v43 = vand.u32 2147483647, %v3004_v20 }
 0x18d   : > { %v2159_v16 = vpop.eup %2158  ;;  %v1522_v62 = vadd.f32 %v1458_v33, %v1328_v0  ;;  %2176 = vpow2.f32 %v875_v15  ;;  %v879_v39 = vmul.f32 1.442695, %v765_v59  ;;  %v768_v44 = vsub.f32 0.0, %v704_v35 }
 0x18e   : > { %v2161_v41 = vpop.eup %2160  ;;  %v1331_v21 = vmul.f32 %v2630_v9, %v1266_v6  ;;  %v1396_v5 = vmin.f32 %v2985_v36, 100.0  ;;  %v1048_v53 = vmul.f32 0.6931472, %v2159_v16  ;;  %2178 = vlog2.f32 %v954_v3 }
 0x18f   : > { %v2163_v54 = vpop.eup %2162  ;;  %v1586_v57 = vadd.f32 %v1585_v22, %v1522_v62  ;;  %v1054_v1 = vmul.f32 0.6931472, %v2161_v41  ;;  %2180 = vpow2.f32 %v881_v8  ;;  %v706_v24 = vand.u32 2147483647, %v3008_v27 }
 0x190   : > { %v2165_v10 = vpop.eup %2164  ;;  %v1137_v51 = vadd.f32 %v1048_v53, %v625_v48  ;;  %v1052_v63 = vmul.f32 0.6931472, %v2163_v54  ;;  %v883_v4 = vmul.f32 1.442695, %v767_v49  ;;  %v769_v61 = vsub.f32 0.0, %v705_v43 }
 0x191   : > { %v2167_v60 = vpop.eup %2166  ;;  %v1140_v14 = vadd.f32 %v1054_v1, %v628_v25  ;;  %v1058_v36 = vmul.f32 0.6931472, %v2165_v10  ;;  %2182 = vpow2.f32 %v879_v39  ;;  %v885_v18 = vmul.f32 1.442695, %v768_v44 }
 0x192   : > { %v2169_v7 = vpop.eup %2168  ;;  %v1201_v26 = vsub.f32 %v1137_v51, %v2852_v31  ;;  %v1395_v17 = vmin.f32 %v1137_v51, 100.0  ;;  %v1139_v0 = vadd.f32 %v1052_v63, %v627_v46  ;;  %v1056_v15 = vmul.f32 0.6931472, %v2167_v60  ;;  %v3044_v63 = vpop.xlane.xlu1 %572 }
 0x193   : > { %v1587_v59 = vadd.f32 %v1586_v57, %v1523_v32  ;;  %v1204_v48 = vsub.f32 %v1140_v14, %v2859_v40  ;;  %v3024_v35 = vadd.f32 %v1058_v36, %v630_v52  ;;  %v770_v28 = vsub.f32 0.0, %v706_v24 }
 0x194   : > { %v1265_v25 = vmin.f32 %v1201_v26, 100.0  ;;  %v1203_v6 = vsub.f32 %v1139_v0, %v2871_v13  ;;  %2184 = vpow2.f32 %v883_v4  ;;  %v887_v3 = vmul.f32 1.442695, %v769_v61 }
 0x195   : > { %v1460_v31 = vmul.f32 %v2636_v56, %v1395_v17  ;;  %v1397_v22 = vmin.f32 %v1139_v0, 100.0  ;;  %v1062_v33 = vmul.f32 0.6931472, %v2169_v7  ;;  %2186 = vpow2.f32 %v885_v18 }
 0x196   : > { %v1330_v46 = vmul.f32 %v2630_v9, %v1265_v25  ;;  %v1268_v8 = vmin.f32 %v1204_v48, 100.0  ;;  %v1267_v32 = vmin.f32 %v1203_v6, 100.0  ;;  %v1141_v40 = vadd.f32 %v1056_v15, %v629_v50 }
 0x197   : > { %v2171_v52 = vpop.eup %2170  ;;  %v1461_v49 = vmul.f32 %v2636_v56, %v1396_v5  ;;  %v1398_v43 = vmin.f32 %v1140_v14, 100.0  ;;  %v1206_v13 = vsub.f32 %v3024_v35, %v2879_v12  ;;  %v889_v16 = vmul.f32 1.442695, %v770_v28 }
 0x198   : > { %v2173_v62 = vpop.eup %2172  ;;  %v1524_v39 = vadd.f32 %v1460_v31, %v1330_v46  ;;  %v1332_v44 = vmul.f32 %v2630_v9, %v1267_v32  ;;  %v1205_v41 = vsub.f32 %v1141_v40, %v2887_v42  ;;  %2188 = vpow2.f32 %v887_v3  ;;  %v3046_v42 = vpop.xlane.xlu0 %570 }
 0x199   : > { %v2175_v53 = vpop.eup %2174  ;;  %v1525_v54 = vadd.f32 %v1461_v49, %v1331_v21  ;;  %v3038_v50 = vadd.f32 %v1062_v33, %v632_v58  ;;  %v633_v5 = vmax.f32 %v2923_v34, 0.0  ;;  %v636_v57 = vmax.f32 %v2944_v29, 0.0  ;;  %v3058_v33 = vpop.xlane.xlu1 %576 }
 0x19a   : > { %v2177_v1 = vpop.eup %2176  ;;  %v1588_v12 = vadd.f32 %v1587_v59, %v1524_v39  ;;  %v1333_v24 = vmul.f32 %v2630_v9, %v1268_v8  ;;  %v1462_v10 = vmul.f32 %v2636_v56, %v1397_v22  ;;  %v1269_v51 = vmin.f32 %v1205_v41, 100.0 }
 0x19b   : > { %v2179_v21 = vpop.eup %2178  ;;  %v1463_v4 = vmul.f32 %v2636_v56, %v1398_v43  ;;  %v1270_v58 = vmin.f32 %v1206_v13, 100.0  ;;  %v1060_v61 = vmul.f32 0.6931472, %v2171_v52  ;;  %2190 = vpow2.f32 %v889_v16 }
 0x19c   : > { %v2181_v60 = vpop.eup %2180  ;;  %v1589_v14 = vadd.f32 %v1588_v12, %v1525_v54  ;;  %v1526_v36 = vadd.f32 %v1462_v10, %v1332_v44  ;;  %v1399_v18 = vmin.f32 %v1141_v40, 100.0  ;;  %v953_v7 = vadd.f32 1.0, %v2173_v62  ;;  %v3060_v46 = vpop.xlane.xlu0 %574 }
 0x19d   : > { %v1208_v26 = vsub.f32 %v3038_v50, %v2893_v23  ;;  %v1143_v17 = vadd.f32 %v1060_v61, %v631_v30  ;;  %v956_v0 = vadd.f32 1.0, %v2175_v53  ;;  %v955_v15 = vadd.f32 1.0, %v2177_v1 }
 0x19e   : > { %v2183_v59 = vpop.eup %2182  ;;  %v1527_v48 = vadd.f32 %v1463_v4, %v1333_v24  ;;  %v1590_v28 = vadd.f32 %v1589_v14, %v1526_v36  ;;  %v1334_v25 = vmul.f32 %v2630_v9, %v1269_v51  ;;  %2192 = vlog2.f32 %v953_v7 }
 0x19f   : > { %v1400_v6 = vmin.f32 %v3024_v35, 100.0  ;;  %v1207_v3 = vsub.f32 %v1143_v17, %v2904_v11  ;;  %v1066_v31 = vmul.f32 0.6931472, %v2179_v21  ;;  %2194 = vlog2.f32 %v956_v0 }
 0x1a0   : > { %v1591_v22 = vadd.f32 %v1590_v28, %v1527_v48  ;;  %v1464_v23 = vmul.f32 %v2636_v56, %v1399_v18  ;;  %2196 = vlog2.f32 %v955_v15  ;;  %v708_v30 = vand.u32 2147483647, %v3044_v63  ;;  %v3077_v61 = vpop.xlane.xlu0 %578 }
 0x1a1   : > { %v2185_v8 = vpop.eup %2184  ;;  %v1272_v32 = vmin.f32 %v1208_v26, 100.0  ;;  %v958_v40 = vadd.f32 1.0, %v2181_v60  ;;  %v957_v52 = vadd.f32 1.0, %v2183_v59  ;;  %v707_v35 = vand.u32 2147483647, %v3046_v42 }
 0x1a2   : > { %v2187_v49 = vpop.eup %2186  ;;  %v1335_v11 = vmul.f32 %v2630_v9, %v1270_v58  ;;  %v1528_v43 = vadd.f32 %v1464_v23, %v1334_v25  ;;  %v1271_v13 = vmin.f32 %v1207_v3, 100.0  ;;  %v635_v16 = vmax.f32 %v2946_v37, 0.0  ;;  %v3075_v58 = vpop.xlane.xlu1 %580 }
 0x1a3   : > { %v1465_v62 = vmul.f32 %v2636_v56, %v1400_v6  ;;  %v1402_v39 = vmin.f32 %v3038_v50, 100.0  ;;  %v3069_v44 = vadd.f32 %v1066_v31, %v634_v55  ;;  %2198 = vlog2.f32 %v958_v40 }
 0x1a4   : > { %v1592_v41 = vadd.f32 %v1591_v22, %v1528_v43  ;;  %v1401_v53 = vmin.f32 %v1143_v17, 100.0  ;;  %2200 = vlog2.f32 %v957_v52  ;;  %v959_v54 = vadd.f32 1.0, %v2185_v8 }
 0x1a5   : > { %v2189_v1 = vpop.eup %2188  ;;  %v1337_v12 = vmul.f32 %v2630_v9, %v1272_v32  ;;  %v772_v24 = vsub.f32 0.0, %v708_v30  ;;  %v771_v10 = vsub.f32 0.0, %v707_v35  ;;  %v710_v51 = vand.u32 2147483647, %v3058_v33 }
 0x1a6   : > { %v1529_v21 = vadd.f32 %v1465_v62, %v1335_v11  ;;  %v1336_v50 = vmul.f32 %v2630_v9, %v1271_v13  ;;  %v960_v4 = vadd.f32 1.0, %v2187_v49  ;;  %v709_v55 = vand.u32 2147483647, %v3060_v46  ;;  %v3093_v35 = vpop.xlane.xlu1 %584 }
 0x1a7   : > { %v1467_v60 = vmul.f32 %v2636_v56, %v1402_v39  ;;  %v1210_v14 = vsub.f32 %v3069_v44, %v2910_v38  ;;  %v637_v36 = vmax.f32 %v2971_v2, 0.0  ;;  %v774_v18 = vsub.f32 0.0, %v710_v51 }
 0x1a8   : > { %v2191_v7 = vpop.eup %2190  ;;  %v1593_v26 = vadd.f32 %v1592_v41, %v1529_v21  ;;  %v1466_v17 = vmul.f32 %v2636_v56, %v1401_v53  ;;  %2202 = vlog2.f32 %v959_v54  ;;  %v961_v0 = vadd.f32 1.0, %v2189_v1 }
 0x1a9   : > { %v1531_v15 = vadd.f32 %v1467_v60, %v1337_v12  ;;  %v1404_v59 = vmin.f32 %v3069_v44, 100.0  ;;  %v893_v48 = vmul.f32 1.442695, %v772_v24  ;;  %v711_v28 = vand.u32 2147483647, %v3077_v61 }
 0x1aa   : > { %v1530_v25 = vadd.f32 %v1466_v17, %v1336_v50  ;;  %2204 = vlog2.f32 %v960_v4  ;;  %v891_v38 = vmul.f32 1.442695, %v771_v10  ;;  %v773_v6 = vsub.f32 0.0, %v709_v55 }
 0x1ab   : > { %v2193_v3 = vpop.eup %2192  ;;  %v1274_v31 = vmin.f32 %v1210_v14, 100.0  ;;  %v962_v22 = vadd.f32 1.0, %v2191_v7  ;;  %v897_v23 = vmul.f32 1.442695, %v774_v18  ;;  %v712_v30 = vand.u32 2147483647, %v3075_v58 }
 0x1ac   : > { %v2195_v8 = vpop.eup %2194  ;;  %v1594_v32 = vadd.f32 %v1593_v26, %v1530_v25  ;;  %v1064_v40 = vmul.f32 0.6931472, %v2193_v3  ;;  %2206 = vlog2.f32 %v961_v0  ;;  %v775_v52 = vsub.f32 0.0, %v711_v28 }
 0x1ad   : > { %v2197_v49 = vpop.eup %2196  ;;  %v1070_v11 = vmul.f32 0.6931472, %v2195_v8  ;;  %2208 = vpow2.f32 %v893_v48  ;;  %v1629_v43 = vsub.f32 0.0, %v3093_v35  ;;  %v895_v39 = vmul.f32 1.442695, %v773_v6 }
 0x1ae   : > { %v1145_v13 = vadd.f32 %v1064_v40, %v633_v5  ;;  %v1068_v62 = vmul.f32 0.6931472, %v2197_v49  ;;  %2210 = vpow2.f32 %v891_v38  ;;  %v776_v41 = vsub.f32 0.0, %v712_v30 }
 0x1af   : > { %v1148_v44 = vadd.f32 %v1070_v11, %v636_v57  ;;  %2212 = vpow2.f32 %v897_v23  ;;  %v899_v24 = vmul.f32 1.442695, %v775_v52  ;;  %v2349_v10 = vmov 0.0  }
 0x1b0   : > { %v2199_v53 = vpop.eup %2198  ;;  %v1209_v54 = vsub.f32 %v1145_v13, %v2923_v34  ;;  %v1403_v1 = vmin.f32 %v1145_v13, 100.0  ;;  %v1147_v12 = vadd.f32 %v1068_v62, %v635_v16  ;;  %259 = vst.msk [vmem:[%s3100_s14] sm:$0x1] %vm258_vm0, %v2349_v10  ;;  %v1339_v51 = vmul.f32 %v2630_v9, %v1274_v31 }
 0x1b1   : > { %v2201_v5 = vpop.eup %2200  ;;  %v1595_v21 = vadd.f32 %v1594_v32, %v1531_v15  ;;  %2214 = vlog2.f32 %v962_v22  ;;  %v1630_v50 = vmul.f32 1.442695, %v1629_v43  ;;  %v714_v34 = vand.u32 2147483647, %v3093_v35 }
 0x1b2   : > { %v1273_v57 = vmin.f32 %v1209_v54, 100.0  ;;  %v1211_v4 = vsub.f32 %v1147_v12, %v2946_v37  ;;  %2216 = vpow2.f32 %v895_v39  ;;  %v1212_v55 = vsub.f32 %v1148_v44, %v2944_v29 }
 0x1b3   : > { %v1074_v60 = vmul.f32 0.6931472, %v2199_v53  ;;  %v1072_v16 = vmul.f32 0.6931472, %v2201_v5  ;;  %v901_v14 = vmul.f32 1.442695, %v776_v41  ;;  %v1468_v7 = vmul.f32 %v2636_v56, %v1403_v1 }
 0x1b4   : > { %v1338_v18 = vmul.f32 %v2630_v9, %v1273_v57  ;;  %v1275_v26 = vmin.f32 %v1211_v4, 100.0  ;;  %2218 = vpow2.f32 %v899_v24  ;;  %v638_v0 = vmax.f32 %v2978_v45, 0.0 }
 0x1b5   : > { %v2203_v17 = vpop.eup %2202  ;;  %v1149_v37 = vadd.f32 %v1072_v16, %v637_v36  ;;  %2220 = vpow2.f32 %v1630_v50  ;;  %v1469_v15 = vmul.f32 %v2636_v56, %v1404_v59  ;;  %v1405_v29 = vmin.f32 %v1147_v12, 100.0 }
 0x1b6   : > { %v1532_v48 = vadd.f32 %v1468_v7, %v1338_v18  ;;  %v778_v28 = vsub.f32 0.0, %v714_v34  ;;  %v1276_v38 = vmin.f32 %v1212_v55, 100.0  ;;  %v1150_v6 = vadd.f32 %v1074_v60, %v638_v0 }
 0x1b7   : > { %v2205_v25 = vpop.eup %2204  ;;  %v1213_v3 = vsub.f32 %v1149_v37, %v2971_v2  ;;  %2222 = vpow2.f32 %v901_v14  ;;  %v1533_v31 = vadd.f32 %v1469_v15, %v1339_v51  ;;  %v1340_v23 = vmul.f32 %v2630_v9, %v1275_v26 }
 0x1b8   : > { %v1596_v22 = vadd.f32 %v1595_v21, %v1532_v48  ;;  %v1076_v30 = vmul.f32 0.6931472, %v2203_v17  ;;  %v1406_v32 = vmin.f32 %v1148_v44, 100.0  ;;  %v639_v36 = vmax.f32 %v2988_v47, 0.0 }
 0x1b9   : > { %v2207_v8 = vpop.eup %2206  ;;  %v1470_v52 = vmul.f32 %v2636_v56, %v1405_v29  ;;  %v1078_v49 = vmul.f32 0.6931472, %v2205_v25  ;;  %v905_v11 = vmul.f32 1.442695, %v778_v28  ;;  %v1341_v13 = vmul.f32 %v2630_v9, %v1276_v38 }
 0x1ba   : > { %v2209_v40 = vpop.eup %2208  ;;  %v1597_v59 = vadd.f32 %v1596_v22, %v1533_v31  ;;  %v1214_v2 = vsub.f32 %v1150_v6, %v2978_v45  ;;  %v1277_v62 = vmin.f32 %v1213_v3, 100.0  ;;  %v640_v53 = vmax.f32 %v2997_v19, 0.0 }
 0x1bb   : > { %v2211_v43 = vpop.eup %2210  ;;  %v1534_v41 = vadd.f32 %v1470_v52, %v1340_v23  ;;  %v1151_v54 = vadd.f32 %v1076_v30, %v639_v36  ;;  %v1471_v44 = vmul.f32 %v2636_v56, %v1406_v32  ;;  %v1407_v1 = vmin.f32 %v1149_v37, 100.0 }
 0x1bc   : > { %v2213_v39 = vpop.eup %2212  ;;  %v964_v12 = vadd.f32 1.0, %v2209_v40  ;;  %v1152_v5 = vadd.f32 %v1078_v49, %v640_v53  ;;  %2224 = vpow2.f32 %v905_v11  ;;  %v1278_v50 = vmin.f32 %v1214_v2, 100.0 }
 0x1bd   : > { %v1598_v10 = vadd.f32 %v1597_v59, %v1534_v41  ;;  %v1535_v21 = vadd.f32 %v1471_v44, %v1341_v13  ;;  %v1342_v57 = vmul.f32 %v2630_v9, %v1277_v62  ;;  %v1215_v45 = vsub.f32 %v1151_v54, %v2988_v47  ;;  %v3135_v47 = vpop.xlane.xlu0 %582 }
 0x1be   : > { %v2215_v24 = vpop.eup %2214  ;;  %2226 = vlog2.f32 %v964_v12  ;;  %v1080_v4 = vmul.f32 0.6931472, %v2207_v8  ;;  %v963_v34 = vadd.f32 1.0, %v2211_v43  ;;  %v966_v55 = vadd.f32 1.0, %v2213_v39 }
 0x1bf   : > { %v2217_v51 = vpop.eup %2216  ;;  %v1408_v16 = vmin.f32 %v1150_v6, 100.0  ;;  %v1472_v14 = vmul.f32 %v2636_v56, %v1407_v1  ;;  %v641_v18 = vmax.f32 %v3004_v20, 0.0  ;;  %v1599_v26 = vadd.f32 %v1598_v10, %v1535_v21 }
 0x1c0   : > { %v1216_v17 = vsub.f32 %v1152_v5, %v2997_v19  ;;  %2228 = vlog2.f32 %v963_v34  ;;  %v965_v0 = vadd.f32 1.0, %v2217_v51  ;;  %v1343_v37 = vmul.f32 %v2630_v9, %v1278_v50 }
 0x1c1   : > { %v2219_v60 = vpop.eup %2218  ;;  %v1536_v15 = vadd.f32 %v1472_v14, %v1342_v57  ;;  %v1082_v48 = vmul.f32 0.6931472, %v2215_v24  ;;  %2230 = vlog2.f32 %v966_v55  ;;  %v1279_v28 = vmin.f32 %v1215_v45, 100.0 }
 0x1c2   : > { %v2221_v7 = vpop.eup %2220  ;;  %v1153_v25 = vadd.f32 %v1080_v4, %v641_v18  ;;  %2232 = vlog2.f32 %v965_v0  ;;  %v967_v38 = vadd.f32 1.0, %v2219_v60  ;;  %v1473_v6 = vmul.f32 %v2636_v56, %v1408_v16 }
 0x1c3   : > { %v642_v3 = vmax.f32 %v3008_v27, 0.0  ;;  %v1632_v31 = vadd.f32 1.0, %v2221_v7  ;;  %v1600_v19 = vadd.f32 %v1599_v26, %v1536_v15  ;;  %v1280_v22 = vmin.f32 %v1216_v17, 100.0 }
 0x1c4   : > { %v2223_v29 = vpop.eup %2222  ;;  %v1409_v23 = vmin.f32 %v1151_v54, 100.0  ;;  %v713_v30 = vand.u32 2147483647, %v3135_v47  ;;  %v1537_v8 = vadd.f32 %v1473_v6, %v1343_v37  ;;  %2234 = vlog2.f32 %v967_v38 }
 0x1c5   : > { %v1154_v32 = vadd.f32 %v1082_v48, %v642_v3  ;;  %v968_v36 = vadd.f32 1.0, %v2223_v29  ;;  %v1344_v40 = vmul.f32 %v2630_v9, %v1279_v28  ;;  %v1217_v59 = vsub.f32 %v1153_v25, %v3004_v20 }
 0x1c6   : > { %2236 = vrcp.f32 %v1632_v31  ;;  %v777_v52 = vsub.f32 0.0, %v713_v30  ;;  %v1410_v49 = vmin.f32 %v1152_v5, 100.0  ;;  %v1601_v11 = vadd.f32 %v1600_v19, %v1537_v8 }
 0x1c7   : > { %v1474_v43 = vmul.f32 %v2636_v56, %v1409_v23  ;;  %v1345_v62 = vmul.f32 %v2630_v9, %v1280_v22  ;;  %2238 = vlog2.f32 %v968_v36  ;;  %v1218_v53 = vsub.f32 %v1154_v32, %v3008_v27 }
 0x1c8   : > { %v903_v13 = vmul.f32 1.442695, %v777_v52  ;;  %v1281_v54 = vmin.f32 %v1217_v59, 100.0  ;;  %v1411_v44 = vmin.f32 %v1153_v25, 100.0  ;;  %v644_v20 = vmax.f32 %v3044_v63, 0.0 }
 0x1c9   : > { %v2225_v2 = vpop.eup %2224  ;;  %v1538_v41 = vadd.f32 %v1474_v43, %v1344_v40  ;;  %v1475_v12 = vmul.f32 %v2636_v56, %v1410_v49  ;;  %v643_v21 = vmax.f32 %v3046_v42, 0.0  ;;  %v1282_v45 = vmin.f32 %v1218_v53, 100.0 }
 0x1ca   : > { %2240 = vpow2.f32 %v903_v13  ;;  %v970_v10 = vadd.f32 1.0, %v2225_v2  ;;  %v1346_v27 = vmul.f32 %v2630_v9, %v1281_v54  ;;  %v1412_v55 = vmin.f32 %v1154_v32, 100.0 }
 0x1cb   : > { %v2227_v39 = vpop.eup %2226  ;;  %v1602_v24 = vadd.f32 %v1601_v11, %v1538_v41  ;;  %v1539_v57 = vadd.f32 %v1475_v12, %v1345_v62  ;;  %v1476_v60 = vmul.f32 %v2636_v56, %v1411_v44  ;;  %v645_v16 = vmax.f32 %v3060_v46, 0.0 }
 0x1cc   : > { %v1086_v1 = vmul.f32 0.6931472, %v2227_v39  ;;  %2242 = vlog2.f32 %v970_v10  ;;  %v1347_v37 = vmul.f32 %v2630_v9, %v1282_v45  ;;  %v646_v25 = vmax.f32 %v3058_v33, 0.0 }
 0x1cd   : > { %v2229_v5 = vpop.eup %2228  ;;  %v1603_v14 = vadd.f32 %v1602_v24, %v1539_v57  ;;  %v1540_v15 = vadd.f32 %v1476_v60, %v1346_v27  ;;  %v1477_v38 = vmul.f32 %v2636_v56, %v1412_v55  ;;  %v647_v36 = vmax.f32 %v3077_v61, 0.0 }
 0x1ce   : > { %v1156_v51 = vadd.f32 %v1086_v1, %v644_v20  ;;  %v2231_v50 = vpop.eup %2230  ;;  %v1084_v4 = vmul.f32 0.6931472, %v2229_v5 }
 0x1cf   : > { %v2233_v34 = vpop.eup %2232  ;;  %v1090_v17 = vmul.f32 0.6931472, %v2231_v50  ;;  %v1604_v6 = vadd.f32 %v1603_v14, %v1540_v15  ;;  %v1541_v23 = vadd.f32 %v1477_v38, %v1347_v37  ;;  %v650_v50 = vmax.f32 %v3093_v35, 0.0 }
 0x1d0   : > { %v1155_v18 = vadd.f32 %v1084_v4, %v643_v21  ;;  %v1088_v7 = vmul.f32 0.6931472, %v2233_v34  ;;  %v1220_v26 = vsub.f32 %v1156_v51, %v3044_v63  ;;  %v1414_v40 = vmin.f32 %v1156_v51, 100.0 }
 0x1d1   : > { %v2235_v0 = vpop.eup %2234  ;;  %v1158_v19 = vadd.f32 %v1090_v17, %v646_v25  ;;  %v1605_v59 = vadd.f32 %v1604_v6, %v1541_v23  ;;  %v649_v17 = vmax.f32 %v3135_v47, 0.0 }
 0x1d2   : > { %v1219_v48 = vsub.f32 %v1155_v18, %v3046_v42  ;;  %v1157_v29 = vadd.f32 %v1088_v7, %v645_v16  ;;  %v1413_v3 = vmin.f32 %v1155_v18, 100.0  ;;  %v1284_v31 = vmin.f32 %v1220_v26, 100.0 }
 0x1d3   : > { %v2237_v28 = vpop.eup %2236  ;;  %v1092_v32 = vmul.f32 0.6931472, %v2235_v0  ;;  %v1222_v43 = vsub.f32 %v1158_v19, %v3058_v33  ;;  %v1479_v41 = vmul.f32 %v2636_v56, %v1414_v40  ;;  %v1416_v33 = vmin.f32 %v1158_v19, 100.0 }
 0x1d4   : > { %v1283_v63 = vmin.f32 %v1219_v48, 100.0  ;;  %1636 = vst.msk [vmem:[%s253_s26 - $0x7] sm:$0x80] %vm1635_vm1, %v2237_v28  ;;  %v2239_v22 = vpop.eup %2238  ;;  %v1221_v8 = vsub.f32 %v1157_v29, %v3060_v46  ;;  %v1478_v52 = vmul.f32 %v2636_v56, %v1413_v3  ;;  %v1349_v11 = vmul.f32 %v2630_v9, %v1284_v31 }
 0x1d5   : > { %v1094_v13 = vmul.f32 0.6931472, %v2239_v22  ;;  %v1159_v39 = vadd.f32 %v1092_v32, %v647_v36  ;;  %v648_v46 = vmax.f32 %v3075_v58, 0.0  ;;  %v1415_v54 = vmin.f32 %v1157_v29, 100.0 }
 0x1d6   : > { %v1348_v30 = vmul.f32 %v2630_v9, %v1283_v63  ;;  %v1285_v62 = vmin.f32 %v1221_v8, 100.0  ;;  %v1543_v1 = vadd.f32 %v1479_v41, %v1349_v11  ;;  %v1286_v12 = vmin.f32 %v1222_v43, 100.0 }
 0x1d7   : > { %v2241_v42 = vpop.eup %2240  ;;  %v1160_v20 = vadd.f32 %v1094_v13, %v648_v46  ;;  %v1223_v10 = vsub.f32 %v1159_v39, %v3077_v61  ;;  %v1480_v51 = vmul.f32 %v2636_v56, %v1415_v54  ;;  %v1481_v34 = vmul.f32 %v2636_v56, %v1416_v33  ;;  %v1550_v13 = vld [vmem:[%s3100_s14] sm:$0x1] }
 0x1d8   : > { %v969_v49 = vadd.f32 1.0, %v2241_v42  ;;  %v1542_v2 = vadd.f32 %v1478_v52, %v1348_v30  ;;  %v1350_v24 = vmul.f32 %v2630_v9, %v1285_v62  ;;  %v1351_v57 = vmul.f32 %v2630_v9, %v1286_v12 }
 0x1d9   : > { %v2243_v44 = vpop.eup %2242  ;;  %v1224_v27 = vsub.f32 %v1160_v20, %v3075_v58  ;;  %v1287_v4 = vmin.f32 %v1223_v10, 100.0  ;;  %v1417_v60 = vmin.f32 %v1159_v39, 100.0  ;;  %v1418_v26 = vmin.f32 %v1160_v20, 100.0 }
 0x1da   : > { %2244 = vlog2.f32 %v969_v49  ;;  %v1606_v53 = vadd.f32 %v1605_v59, %v1542_v2  ;;  %v1098_v21 = vmul.f32 0.6931472, %v2243_v44  ;;  %v1544_v45 = vadd.f32 %v1480_v51, %v1350_v24 }
 0x1db   : > { %v1545_v14 = vadd.f32 %v1481_v34, %v1351_v57  ;;  %v1288_v61 = vmin.f32 %v1224_v27, 100.0  ;;  %v1352_v18 = vmul.f32 %v2630_v9, %v1287_v4  ;;  %v1482_v37 = vmul.f32 %v2636_v56, %v1417_v60 }
 0x1dc   : > { %v1607_v5 = vadd.f32 %v1606_v53, %v1543_v1  ;;  %v1162_v16 = vadd.f32 %v1098_v21, %v650_v50  ;;  %v1483_v25 = vmul.f32 %v2636_v56, %v1418_v26 }
 0x1dd   : > { %v1353_v48 = vmul.f32 %v2630_v9, %v1288_v61  ;;  %v1546_v29 = vadd.f32 %v1482_v37, %v1352_v18 }
 0x1de   : > { %v1608_v55 = vadd.f32 %v1607_v5, %v1544_v45  ;;  %v1226_v15 = vsub.f32 %v1162_v16, %v3093_v35  ;;  %v1420_v19 = vmin.f32 %v1162_v16, 100.0 }
 0x1df   : > { %v1547_v31 = vadd.f32 %v1483_v25, %v1353_v48 }
 0x1e0   : > { %v1609_v0 = vadd.f32 %v1608_v55, %v1545_v14  ;;  %v1290_v6 = vmin.f32 %v1226_v15, 100.0  ;;  %v1485_v32 = vmul.f32 %v2636_v56, %v1420_v19 }
 0x1e2   : > { %v1610_v38 = vadd.f32 %v1609_v0, %v1546_v29  ;;  %v1355_v23 = vmul.f32 %v2630_v9, %v1290_v6 }
 0x1e4   : > { %v1611_v30 = vadd.f32 %v1610_v38, %v1547_v31  ;;  %v1549_v36 = vadd.f32 %v1485_v32, %v1355_v23 }
 0x1e7   : > { %v2245_v7 = vpop.eup %2244 }
 0x1e8   : > { %v1096_v58 = vmul.f32 0.6931472, %v2245_v7 }
 0x1ea   : > { %v1161_v28 = vadd.f32 %v1096_v58, %v649_v17 }
 0x1ec   : > { %v1225_v63 = vsub.f32 %v1161_v28, %v3135_v47  ;;  %v1419_v3 = vmin.f32 %v1161_v28, 100.0 }
 0x1ee   : > { %v1289_v22 = vmin.f32 %v1225_v63, 100.0  ;;  %v1484_v8 = vmul.f32 %v2636_v56, %v1419_v3 }
 0x1f0   : > { %v1354_v35 = vmul.f32 %v2630_v9, %v1289_v22 }
 0x1f2   : > { %v1548_v42 = vadd.f32 %v1484_v8, %v1354_v35 }
 0x1f4   : > { %v1612_v47 = vadd.f32 %v1611_v30, %v1548_v42 }
 0x1f6   : > { %v1613_v40 = vadd.f32 %v1612_v47, %v1549_v36 }
 0x1f8   : > { %v1614_v59 = vrot.slane %v1613_v40, 4 }
 0x1fa   : > { %v1615_v52 = vadd.f32 %v1614_v59, %v1613_v40 }
 0x1fc   : > { %v1616_v49 = vrot.slane %v1615_v52, 2 }
 0x1fe   : > { %v1617_v11 = vadd.f32 %v1616_v49, %v1615_v52 }
 0x200   : > { %v1618_v43 = vrot.slane %v1617_v11, 1 }
 0x202   : > { %v1619_v2 = vadd.f32 %v1618_v43, %v1617_v11 }
 0x204   : > { %v1620_v62 = vadd.f32 %v1619_v2, %v1550_v13 }
 0x206   : > { %1622 = vst.msk [vmem:[%s3100_s14] sm:$0x1] %vm258_vm0, %v1620_v62 }
 0x20d   : > { %v1626_v9 = vld [vmem:[%s3100_s14] sm:$0x1] }
 0x20e   : > { %v1627_v39 = vmul.f32 0.001953125, %v1626_v9 }
 0x210   : > { %1628 = vst.msk [vmem:[%s3100_s14] sm:$0x1] %vm258_vm0, %v1627_v39 }
 0x211 PF: > { %s19_s20 = sadd.s32 1, %s2343_s20   ;;  %s3224_s15 = smov %s2327_s16 }
 0x212   : > { %p16_p12 = scmp.ge.s32.totalorder %s19_s20, 4   ;;  %s3225_s16 = smov %s2331_s17 }
 0x213   : > { %s3226_s17 = smov %s2460_s9  ;;  %s3227_s18 = smov %s2339_s19 }
 0x214   : > { %s3228_s19 = smov %s3230_s7  ;;  %18 = sbr.rel (!%p16_p12) target bundleno = 5 (0x5), region = 97 }
 0x219   :  { %1666 = vsyncpa [#allocation3], 1 }
 0x21a   :  { %1668 = vsyncpa [#allocation3 + $0x1], 1 }
 0x21b   :  { %1669 = vsyncpa [#allocation4], 1 }
 0x21c   :  { %1671 = vsyncpa [#allocation4 + $0x1], 1 }

</bundles_post_ra>
